<compile_context>
chip_gen: v6e
topology: v6e:2x2x1
jax: 0.10.0
libtpu: 0.0.40
codegen_flags: <defaults>
</compile_context>

<pallas_src>
import functools

import jax
import jax.numpy as jnp
import numpy as np
from jax.experimental import pallas as pl
from jax.experimental.pallas import tpu as pltpu


def _softmax(x, axis):
    m = jnp.max(x, axis=axis, keepdims=True)
    e = jnp.exp(x - m)
    s = jnp.sum(e, axis=axis, keepdims=True)
    return e * pl.reciprocal(s, approx=True)


def _prenorm_linattn_kernel(x_ref, wqkv_ref, bqkv_ref, wout_ref, params_ref,
                            o_ref, *, heads, dim_head, scale, eps,
                            reassociate):
    f32 = jnp.float32
    bf16 = jnp.bfloat16

    x = x_ref[0]                                  # (C, N): channels-first, N lane-dense
    c, n = x.shape
    hidden = heads * dim_head
    inv_cnt = 1.0 / float(c * n)

    # packed per-channel params: one (C, 3) VMEM block
    b_out = params_ref[:, 0:1]                    # (C, 1), broadcasts over N
    gnw_post = params_ref[:, 1:2]
    gnb_post = params_ref[:, 2:3]

    # --- PreNorm: GroupNorm(1, C), single-pass stats; affine folded into wqkv/bqkv ---
    s = jnp.sum(x)
    s2 = jnp.sum(x * x)
    mu = s * inv_cnt
    var = jnp.maximum(s2 * inv_cnt - mu * mu, 0.0)
    xn = (x - mu) * jax.lax.rsqrt(var + eps)      # (C, N), no affine pass

    # --- fn = LinearAttention ---
    # to_qkv 1x1 conv: plain (3H, C) @ (C, N) matmul + folded-affine bias.
    qkv = jnp.dot(wqkv_ref[...].astype(bf16), xn.astype(bf16),
                  preferred_element_type=f32) + bqkv_ref[...]     # (3H, N)

    # head split via sublane-aligned reshapes (dim_head=32 is a multiple of 8)
    q = qkv[:hidden].reshape(heads, dim_head, n)
    k = qkv[hidden:2 * hidden].reshape(heads, dim_head, n)
    v = qkv[2 * hidden:].reshape(heads, dim_head, n)

    q = _softmax(q, axis=1)                       # over dim_head (torch dim=-2); scale moved
    k = _softmax(k, axis=2)                       # over spatial   (torch dim=-1)

    # contextT[h, e, d] = sum_n v[h, e, n] * k[h, d, n]   (batched over heads)
    contextT = jax.lax.dot_general(
        v.astype(bf16), k.astype(bf16),
        (((2,), (2,)), ((0,), (0,))),
        preferred_element_type=f32)               # (H, d, d)
    # scale folded into the (tiny) contextT cast instead of the (H, d, N) q
    contextT = (contextT * scale).astype(bf16)

    if reassociate:
        # C < hidden: reassociate  W_out @ (contextT @ q)  ->  (W_out_h @ contextT_h) @ q
        # wout_ref is (heads, C, d).  Never materializes the (hidden, N) out_all.
        m = jax.lax.dot_general(
            wout_ref[...].astype(bf16), contextT,
            (((2,), (1,)), ((0,), (0,))),
            preferred_element_type=f32)           # (H, C, d)
        y_h = jax.lax.dot_general(
            m.astype(bf16), q.astype(bf16),
            (((2,), (1,)), ((0,), (0,))),
            preferred_element_type=f32)           # (H, C, N)
        y = jnp.sum(y_h, axis=0)                  # (C, N): fuse head sum
    else:
        # C >= hidden: original ordering.  wout_ref is (C, hidden).
        out = jax.lax.dot_general(
            contextT, q.astype(bf16),
            (((2,), (1,)), ((0,), (0,))),
            preferred_element_type=f32)           # (H, d, N)
        out_all = out.reshape(hidden, n)
        y = jnp.dot(wout_ref[...].astype(bf16), out_all.astype(bf16),
                    preferred_element_type=f32)   # (C, N)

    y = y + b_out

    # to_out[1]: GroupNorm(1, C), single-pass stats
    s = jnp.sum(y)
    s2 = jnp.sum(y * y)
    mu2 = s * inv_cnt
    var2 = jnp.maximum(s2 * inv_cnt - mu2 * mu2, 0.0)
    y = (y - mu2) * jax.lax.rsqrt(var2 + eps)
    y = y * gnw_post + gnb_post

    o_ref[0] = y


def prenorm_linear_attention_pallas(x_nchw, gn_pre_w, gn_pre_b, w_qkv, w_out,
                                    b_out, gn_post_w, gn_post_b,
                                    *, heads, dim_head):
    """x_nchw: (B, C, H, W).  w_qkv: (C, 3*hidden) (= conv weight[:,:,0,0].T),
    w_out: (C, hidden) (= conv weight[:,:,0,0]).  Per-channel vectors are (C,)."""
    b, c, h, w = x_nchw.shape
    n = h * w
    hidden = heads * dim_head
    scale = float(dim_head) ** -0.5
    reassociate = c < hidden

    # channels-first, spatially flattened; pure reshape — no HBM transpose
    x = x_nchw.reshape(b, c, n)

    # Fold the pre-GN affine into the qkv projection (exact algebra):
    #   Wqkv^T @ (g*xn + beta) = (Wqkv^T * g) @ xn + Wqkv^T @ beta
    # and pre-transpose so the kernel's first dot is a plain (3H, C) @ (C, N).
    w_qkv_f = (w_qkv * gn_pre_w[:, None]).T.astype(jnp.float32)   # (3*hidden, C)
    b_qkv = (w_qkv.T @ gn_pre_b)[:, None].astype(jnp.float32)     # (3*hidden, 1)

    if reassociate:
        # per-head layout (heads, C, dim_head) for the reassociated epilogue
        w_out_arg = jnp.transpose(w_out.reshape(c, heads, dim_head), (1, 0, 2))
        w_out_spec = pl.BlockSpec((heads, c, dim_head), lambda i: (0, 0, 0))
    else:
        w_out_arg = w_out.astype(jnp.float32)                     # (C, hidden)
        w_out_spec = pl.BlockSpec((c, hidden), lambda i: (0, 0))

    # remaining per-channel params packed into a single (C, 3) block
    params = jnp.stack([b_out, gn_post_w, gn_post_b], axis=1).astype(jnp.float32)

    # VMEM budget: double-buffered blocks + weights + f32/bf16 intermediates,
    # + headroom for Mosaic internal scratch; capped at 48 MiB (v7x-safe).
    f32b = 4
    est = (
        2 * 2 * c * n * f32b                       # x + out blocks, double-buffered
        + 2 * 3 * hidden * (c + 1) * f32b          # w_qkv_f + b_qkv
        + 2 * (c * hidden + 3 * c) * f32b          # w_out + packed params
        + 3 * hidden * n * (2 * f32b + 2)          # qkv + softmaxed q/k/v + bf16 copies
        + (heads * c + hidden + 2 * c) * n * f32b  # y_h / out_all + y
    )
    vmem_limit = int(min(48 * 2**20, max(16 * 2**20, est + (4 << 20))))

    kernel = functools.partial(_prenorm_linattn_kernel,
                               heads=heads, dim_head=dim_head,
                               scale=scale, eps=1e-5,
                               reassociate=reassociate)

    out = pl.pallas_call(
        kernel,
        out_shape=jax.ShapeDtypeStruct((b, c, n), jnp.float32),
        grid=(b,),
        in_specs=[
            pl.BlockSpec((1, c, n), lambda i: (i, 0, 0)),         # x (lane-dense N)
            pl.BlockSpec((3 * hidden, c), lambda i: (0, 0)),      # folded w_qkv
            pl.BlockSpec((3 * hidden, 1), lambda i: (0, 0)),      # folded qkv bias
            w_out_spec,                                           # w_out (layout per path)
            pl.BlockSpec((c, 3), lambda i: (0, 0)),               # packed params
        ],
        out_specs=pl.BlockSpec((1, c, n), lambda i: (i, 0, 0)),
        compiler_params=pltpu.CompilerParams(
            dimension_semantics=("parallel",),
            vmem_limit_bytes=vmem_limit),
    )(x, w_qkv_f, b_qkv, w_out_arg, params)

    return out.reshape(b, c, h, w)


def prenorm_linear_attention_reference(x_nchw, gn_pre_w, gn_pre_b, w_qkv, w_out,
                                       b_out, gn_post_w, gn_post_b,
                                       *, heads, dim_head):
    """Pure-JAX reference mirroring PreNorm(dim, LinearAttention(dim)) exactly."""
    b, c, h, w = x_nchw.shape
    n = h * w
    hidden = heads * dim_head
    scale = float(dim_head) ** -0.5
    eps = 1e-5

    xf = x_nchw.reshape(b, c, n)                                   # (b, c, n)
    # PreNorm: GroupNorm(1, c)
    mean = xf.mean(axis=(1, 2), keepdims=True)
    var = xf.var(axis=(1, 2), keepdims=True)                       # biased, like torch
    xn = (xf - mean) / jnp.sqrt(var + eps)
    xn = xn * gn_pre_w[None, :, None] + gn_pre_b[None, :, None]

    # LinearAttention
    qkv = jnp.einsum('co,bcn->bon', w_qkv, xn)                     # (b, 3*hidden, n)
    q, k, v = jnp.split(qkv, 3, axis=1)
    q = q.reshape(b, heads, dim_head, n)
    k = k.reshape(b, heads, dim_head, n)
    v = v.reshape(b, heads, dim_head, n)

    q = jax.nn.softmax(q, axis=-2) * scale
    k = jax.nn.softmax(k, axis=-1)

    context = jnp.einsum('bhdn,bhen->bhde', k, v)
    out = jnp.einsum('bhde,bhdn->bhen', context, q)
    out = out.reshape(b, hidden, n)

    y = jnp.einsum('oc,bcn->bon', w_out, out) + b_out[None, :, None]
    mean2 = y.mean(axis=(1, 2), keepdims=True)
    var2 = y.var(axis=(1, 2), keepdims=True)
    y = (y - mean2) / jnp.sqrt(var2 + eps)
    y = y * gn_post_w[None, :, None] + gn_post_b[None, :, None]
    return y.reshape(b, c, h, w)


if __name__ == "__main__":
    B, DIM, H, W = 2, 4, 16, 16
    HEADS, DIM_HEAD = 4, 32
    HIDDEN = HEADS * DIM_HEAD

    key = jax.random.PRNGKey(0)
    ks = jax.random.split(key, 8)

    x = jax.random.normal(ks[0], (B, DIM, H, W), dtype=jnp.float32)

    # Synthetic parameters (conv weights stored channels-last / lane-dense)
    gn_pre_w = 1.0 + 0.1 * jax.random.normal(ks[1], (DIM,), jnp.float32)
    gn_pre_b = 0.1 * jax.random.normal(ks[2], (DIM,), jnp.float32)
    w_qkv = 0.2 * jax.random.normal(ks[3], (DIM, 3 * HIDDEN), jnp.float32)
    w_out = 0.1 * jax.random.normal(ks[4], (DIM, HIDDEN), jnp.float32)
    b_out = 0.1 * jax.random.normal(ks[5], (DIM,), jnp.float32)
    gn_post_w = 1.0 + 0.1 * jax.random.normal(ks[6], (DIM,), jnp.float32)
    gn_post_b = 0.1 * jax.random.normal(ks[7], (DIM,), jnp.float32)

    out = prenorm_linear_attention_pallas(
        x, gn_pre_w, gn_pre_b, w_qkv, w_out, b_out, gn_post_w, gn_post_b,
        heads=HEADS, dim_head=DIM_HEAD)
    out = jax.block_until_ready(out)

    ref = prenorm_linear_attention_reference(
        x, gn_pre_w, gn_pre_b, w_qkv, w_out, b_out, gn_post_w, gn_post_b,
        heads=HEADS, dim_head=DIM_HEAD)
    ref = jax.block_until_ready(ref)

    # NOTE: bf16 MXU operands + approx EUP reciprocal are intentional precision
    # trade-offs (~1e-2 vs the f32 torch reference); covered by the tolerance.
    np.testing.assert_allclose(np.asarray(out), np.asarray(ref),
                               rtol=5e-2, atol=5e-2)
    print("KERNEL_OK")
</pallas_src>

<mosaic_0001>
module attributes {stable_mosaic.version = 11 : i64} {
  func.func @_prenorm_linattn_kernel(%arg0: i32, %arg1: memref<1x4x256xf32, #tpu.memory_space<vmem>>, %arg2: memref<384x4xf32, #tpu.memory_space<vmem>>, %arg3: memref<384x1xf32, #tpu.memory_space<vmem>>, %arg4: memref<4x4x32xf32, #tpu.memory_space<vmem>>, %arg5: memref<4x3xf32, #tpu.memory_space<vmem>>, %arg6: memref<1x4x256xf32, #tpu.memory_space<vmem>>) attributes {dimension_semantics = [#tpu.dimension_semantics<parallel>], iteration_bounds = array<i64: 2>, scalar_prefetch = 0 : i64, scratch_operands = 0 : i64, tpu.core_type = #tpu.core_type<tc>, window_params = [{transform_indices = @transform_0, window_bounds = array<i64: 1, 4, 256>}, {pipeline_mode = #tpu.pipeline_mode<synchronous>, transform_indices = @transform_1, window_bounds = array<i64: 384, 4>}, {pipeline_mode = #tpu.pipeline_mode<synchronous>, transform_indices = @transform_2, window_bounds = array<i64: 384, 1>}, {pipeline_mode = #tpu.pipeline_mode<synchronous>, transform_indices = @transform_3, window_bounds = array<i64: 4, 4, 32>}, {pipeline_mode = #tpu.pipeline_mode<synchronous>, transform_indices = @transform_4, window_bounds = array<i64: 4, 3>}, {transform_indices = @transform_5, window_bounds = array<i64: 1, 4, 256>}]} {
    %c0 = arith.constant 0 : index
    %c0_0 = arith.constant 0 : index
    %c0_1 = arith.constant 0 : index
    %0 = vector.load %arg1[%c0, %c0_0, %c0_1] : memref<1x4x256xf32, #tpu.memory_space<vmem>>, vector<1x4x256xf32>
    %1 = vector.shape_cast %0 : vector<1x4x256xf32> to vector<4x256xf32>
    %c0_2 = arith.constant 0 : index
    %c0_3 = arith.constant 0 : index
    %2 = vector.load %arg5[%c0_2, %c0_3] : memref<4x3xf32, #tpu.memory_space<vmem>>, vector<4x1xf32>
    %c0_4 = arith.constant 0 : index
    %c1 = arith.constant 1 : index
    %3 = vector.load %arg5[%c0_4, %c1] : memref<4x3xf32, #tpu.memory_space<vmem>>, vector<4x1xf32>
    %c0_5 = arith.constant 0 : index
    %c2 = arith.constant 2 : index
    %4 = vector.load %arg5[%c0_5, %c2] : memref<4x3xf32, #tpu.memory_space<vmem>>, vector<4x1xf32>
    %5 = vector.shape_cast %1 : vector<4x256xf32> to vector<1x4x256xf32>
    %cst = arith.constant dense<0.000000e+00> : vector<1xf32>
    %6 = vector.multi_reduction <add>, %5, %cst [1, 2] : vector<1x4x256xf32> to vector<1xf32>
    %7 = vector.shape_cast %6 : vector<1xf32> to vector<1x1x1xf32>
    %8 = vector.extract %7[0, 0, 0] : f32 from vector<1x1x1xf32>
    %9 = arith.mulf %1, %1 : vector<4x256xf32>
    %10 = vector.shape_cast %9 : vector<4x256xf32> to vector<1x4x256xf32>
    %cst_6 = arith.constant dense<0.000000e+00> : vector<1xf32>
    %11 = vector.multi_reduction <add>, %10, %cst_6 [1, 2] : vector<1x4x256xf32> to vector<1xf32>
    %12 = vector.shape_cast %11 : vector<1xf32> to vector<1x1x1xf32>
    %13 = vector.extract %12[0, 0, 0] : f32 from vector<1x1x1xf32>
    %cst_7 = arith.constant 9.765625E-4 : f32
    %14 = arith.mulf %8, %cst_7 : f32
    %cst_8 = arith.constant 9.765625E-4 : f32
    %15 = arith.mulf %13, %cst_8 : f32
    %16 = arith.mulf %14, %14 : f32
    %17 = arith.subf %15, %16 : f32
    %cst_9 = arith.constant 0.000000e+00 : f32
    %18 = arith.maximumf %17, %cst_9 : f32
    %19 = vector.broadcast %14 : f32 to vector<4x256xf32>
    %20 = arith.subf %1, %19 : vector<4x256xf32>
    %cst_10 = arith.constant 9.99999974E-6 : f32
    %21 = arith.addf %18, %cst_10 : f32
    %22 = math.rsqrt %21 : f32
    %23 = vector.broadcast %22 : f32 to vector<4x256xf32>
    %24 = arith.mulf %20, %23 : vector<4x256xf32>
    %c0_11 = arith.constant 0 : index
    %c0_12 = arith.constant 0 : index
    %25 = vector.load %arg2[%c0_11, %c0_12] : memref<384x4xf32, #tpu.memory_space<vmem>>, vector<384x4xf32>
    %26 = arith.truncf %25 : vector<384x4xf32> to vector<384x4xbf16>
    %27 = arith.truncf %24 : vector<4x256xf32> to vector<4x256xbf16>
    %cst_13 = arith.constant dense<0.000000e+00> : vector<384x256xf32>
    %28 = tpu.matmul %26, %27, %cst_13 {dimension_numbers = #tpu.dot_dimension_numbers<[1], [0], [0], [1], [0, 0, 1, 1], [], []>} : vector<384x4xbf16>, vector<4x256xbf16>, vector<384x256xf32> -> vector<384x256xf32>
    %c0_14 = arith.constant 0 : index
    %c0_15 = arith.constant 0 : index
    %29 = vector.load %arg3[%c0_14, %c0_15] : memref<384x1xf32, #tpu.memory_space<vmem>>, vector<384x1xf32>
    %30 = vector.broadcast %29 : vector<384x1xf32> to vector<384x256xf32>
    %31 = arith.addf %28, %30 : vector<384x256xf32>
    %32 = vector.extract_strided_slice %31 {offsets = [0, 0], sizes = [128, 256], strides = [1, 1]} : vector<384x256xf32> to vector<128x256xf32>
    %33 = vector.shape_cast %32 : vector<128x256xf32> to vector<4x32x256xf32>
    %34 = vector.extract_strided_slice %31 {offsets = [128, 0], sizes = [128, 256], strides = [1, 1]} : vector<384x256xf32> to vector<128x256xf32>
    %35 = vector.shape_cast %34 : vector<128x256xf32> to vector<4x32x256xf32>
    %36 = vector.extract_strided_slice %31 {offsets = [256, 0], sizes = [128, 256], strides = [1, 1]} : vector<384x256xf32> to vector<128x256xf32>
    %37 = vector.shape_cast %36 : vector<128x256xf32> to vector<4x32x256xf32>
    %cst_16 = arith.constant dense<0xFF800000> : vector<4x256xf32>
    %38 = vector.multi_reduction <maximumf>, %33, %cst_16 [1] : vector<4x32x256xf32> to vector<4x256xf32>
    %39 = vector.shape_cast %38 : vector<4x256xf32> to vector<4x1x256xf32>
    %40 = vector.broadcast %39 : vector<4x1x256xf32> to vector<4x32x256xf32>
    %41 = arith.subf %33, %40 : vector<4x32x256xf32>
    %42 = math.exp %41 : vector<4x32x256xf32>
    %cst_17 = arith.constant dense<0.000000e+00> : vector<4x256xf32>
    %43 = vector.multi_reduction <add>, %42, %cst_17 [1] : vector<4x32x256xf32> to vector<4x256xf32>
    %44 = vector.shape_cast %43 : vector<4x256xf32> to vector<4x1x256xf32>
    %45 = tpu.reciprocal %44 {approx = true} : vector<4x1x256xf32> -> vector<4x1x256xf32>
    %46 = vector.broadcast %45 : vector<4x1x256xf32> to vector<4x32x256xf32>
    %47 = arith.mulf %42, %46 : vector<4x32x256xf32>
    %cst_18 = arith.constant dense<0xFF800000> : vector<4x32xf32>
    %48 = vector.multi_reduction <maximumf>, %35, %cst_18 [2] : vector<4x32x256xf32> to vector<4x32xf32>
    %49 = vector.shape_cast %48 : vector<4x32xf32> to vector<4x32x1xf32>
    %50 = vector.broadcast %49 : vector<4x32x1xf32> to vector<4x32x256xf32>
    %51 = arith.subf %35, %50 : vector<4x32x256xf32>
    %52 = math.exp %51 : vector<4x32x256xf32>
    %cst_19 = arith.constant dense<0.000000e+00> : vector<4x32xf32>
    %53 = vector.multi_reduction <add>, %52, %cst_19 [2] : vector<4x32x256xf32> to vector<4x32xf32>
    %54 = vector.shape_cast %53 : vector<4x32xf32> to vector<4x32x1xf32>
    %55 = tpu.reciprocal %54 {approx = true} : vector<4x32x1xf32> -> vector<4x32x1xf32>
    %56 = vector.broadcast %55 : vector<4x32x1xf32> to vector<4x32x256xf32>
    %57 = arith.mulf %52, %56 : vector<4x32x256xf32>
    %58 = arith.truncf %37 : vector<4x32x256xf32> to vector<4x32x256xbf16>
    %59 = arith.truncf %57 : vector<4x32x256xf32> to vector<4x32x256xbf16>
    %cst_20 = arith.constant dense<0.000000e+00> : vector<4x32x32xf32>
    %60 = tpu.matmul %58, %59, %cst_20 {dimension_numbers = #tpu.dot_dimension_numbers<[2], [2], [1], [1], [0, 0, 0, 1, 1, 1], [0], [0]>} : vector<4x32x256xbf16>, vector<4x32x256xbf16>, vector<4x32x32xf32> -> vector<4x32x32xf32>
    %cst_21 = arith.constant 0.176776692 : f32
    %61 = vector.broadcast %cst_21 : f32 to vector<4x32x32xf32>
    %62 = arith.mulf %60, %61 : vector<4x32x32xf32>
    %63 = arith.truncf %62 : vector<4x32x32xf32> to vector<4x32x32xbf16>
    %c0_22 = arith.constant 0 : index
    %c0_23 = arith.constant 0 : index
    %c0_24 = arith.constant 0 : index
    %64 = vector.load %arg4[%c0_22, %c0_23, %c0_24] : memref<4x4x32xf32, #tpu.memory_space<vmem>>, vector<4x4x32xf32>
    %65 = arith.truncf %64 : vector<4x4x32xf32> to vector<4x4x32xbf16>
    %cst_25 = arith.constant dense<0.000000e+00> : vector<4x4x32xf32>
    %66 = tpu.matmul %65, %63, %cst_25 {dimension_numbers = #tpu.dot_dimension_numbers<[2], [1], [1], [2], [0, 0, 0, 1, 1, 2], [0], [0]>} : vector<4x4x32xbf16>, vector<4x32x32xbf16>, vector<4x4x32xf32> -> vector<4x4x32xf32>
    %67 = arith.truncf %66 : vector<4x4x32xf32> to vector<4x4x32xbf16>
    %68 = arith.truncf %47 : vector<4x32x256xf32> to vector<4x32x256xbf16>
    %cst_26 = arith.constant dense<0.000000e+00> : vector<4x4x256xf32>
    %69 = tpu.matmul %67, %68, %cst_26 {dimension_numbers = #tpu.dot_dimension_numbers<[2], [1], [1], [2], [0, 0, 0, 1, 1, 2], [0], [0]>} : vector<4x4x32xbf16>, vector<4x32x256xbf16>, vector<4x4x256xf32> -> vector<4x4x256xf32>
    %cst_27 = arith.constant dense<0.000000e+00> : vector<4x256xf32>
    %70 = vector.multi_reduction <add>, %69, %cst_27 [0] : vector<4x4x256xf32> to vector<4x256xf32>
    %71 = vector.broadcast %2 : vector<4x1xf32> to vector<4x256xf32>
    %72 = arith.addf %70, %71 : vector<4x256xf32>
    %73 = vector.shape_cast %72 : vector<4x256xf32> to vector<1x4x256xf32>
    %cst_28 = arith.constant dense<0.000000e+00> : vector<1xf32>
    %74 = vector.multi_reduction <add>, %73, %cst_28 [1, 2] : vector<1x4x256xf32> to vector<1xf32>
    %75 = vector.shape_cast %74 : vector<1xf32> to vector<1x1x1xf32>
    %76 = vector.extract %75[0, 0, 0] : f32 from vector<1x1x1xf32>
    %77 = arith.mulf %72, %72 : vector<4x256xf32>
    %78 = vector.shape_cast %77 : vector<4x256xf32> to vector<1x4x256xf32>
    %cst_29 = arith.constant dense<0.000000e+00> : vector<1xf32>
    %79 = vector.multi_reduction <add>, %78, %cst_29 [1, 2] : vector<1x4x256xf32> to vector<1xf32>
    %80 = vector.shape_cast %79 : vector<1xf32> to vector<1x1x1xf32>
    %81 = vector.extract %80[0, 0, 0] : f32 from vector<1x1x1xf32>
    %cst_30 = arith.constant 9.765625E-4 : f32
    %82 = arith.mulf %76, %cst_30 : f32
    %cst_31 = arith.constant 9.765625E-4 : f32
    %83 = arith.mulf %81, %cst_31 : f32
    %84 = arith.mulf %82, %82 : f32
    %85 = arith.subf %83, %84 : f32
    %cst_32 = arith.constant 0.000000e+00 : f32
    %86 = arith.maximumf %85, %cst_32 : f32
    %87 = vector.broadcast %82 : f32 to vector<4x256xf32>
    %88 = arith.subf %72, %87 : vector<4x256xf32>
    %cst_33 = arith.constant 9.99999974E-6 : f32
    %89 = arith.addf %86, %cst_33 : f32
    %90 = math.rsqrt %89 : f32
    %91 = vector.broadcast %90 : f32 to vector<4x256xf32>
    %92 = arith.mulf %88, %91 : vector<4x256xf32>
    %93 = vector.broadcast %3 : vector<4x1xf32> to vector<4x256xf32>
    %94 = arith.mulf %92, %93 : vector<4x256xf32>
    %95 = vector.broadcast %4 : vector<4x1xf32> to vector<4x256xf32>
    %96 = arith.addf %94, %95 : vector<4x256xf32>
    %c0_34 = arith.constant 0 : index
    %c0_35 = arith.constant 0 : index
    %c0_36 = arith.constant 0 : index
    %97 = vector.load %arg6[%c0_34, %c0_35, %c0_36] : memref<1x4x256xf32, #tpu.memory_space<vmem>>, vector<1x4x256xf32>
    %98 = vector.shape_cast %97 : vector<1x4x256xf32> to vector<4x256xf32>
    %99 = vector.shape_cast %96 : vector<4x256xf32> to vector<1x4x256xf32>
    tpu.vector_store %arg6[%c0_34, %c0_35, %c0_36], %99 {strides = array<i32>} : memref<1x4x256xf32, #tpu.memory_space<vmem>>, vector<1x4x256xf32>,
    return
  }
  func.func @transform_0(%arg0: i32) -> (i32, i32, i32) {
    %c0_i32 = arith.constant 0 : i32
    %c0_i32_0 = arith.constant 0 : i32
    %c0_i32_1 = arith.constant 0 : i32
    return %arg0, %c0_i32, %c0_i32_0 : i32, i32, i32
  }
  func.func @transform_1(%arg0: i32) -> (i32, i32) {
    %c0_i32 = arith.constant 0 : i32
    %c0_i32_0 = arith.constant 0 : i32
    %c0_i32_1 = arith.constant 0 : i32
    return %c0_i32, %c0_i32_0 : i32, i32
  }
  func.func @transform_2(%arg0: i32) -> (i32, i32) {
    %c0_i32 = arith.constant 0 : i32
    %c0_i32_0 = arith.constant 0 : i32
    %c0_i32_1 = arith.constant 0 : i32
    return %c0_i32, %c0_i32_0 : i32, i32
  }
  func.func @transform_3(%arg0: i32) -> (i32, i32, i32) {
    %c0_i32 = arith.constant 0 : i32
    %c0_i32_0 = arith.constant 0 : i32
    %c0_i32_1 = arith.constant 0 : i32
    %c0_i32_2 = arith.constant 0 : i32
    return %c0_i32, %c0_i32_0, %c0_i32_1 : i32, i32, i32
  }
  func.func @transform_4(%arg0: i32) -> (i32, i32) {
    %c0_i32 = arith.constant 0 : i32
    %c0_i32_0 = arith.constant 0 : i32
    %c0_i32_1 = arith.constant 0 : i32
    return %c0_i32, %c0_i32_0 : i32, i32
  }
  func.func @transform_5(%arg0: i32) -> (i32, i32, i32) {
    %c0_i32 = arith.constant 0 : i32
    %c0_i32_0 = arith.constant 0 : i32
    %c0_i32_1 = arith.constant 0 : i32
    return %arg0, %c0_i32, %c0_i32_0 : i32, i32, i32
  }
}

</mosaic_0001>

<bundles_post_ra>
// kernel: tpu_custom_call.1
= control target key start
LH: loop header
LB: loop body
LE: loop exit
PB: predicated region body
PF: predicated region fallthrough
CT: control target
= control target key end

     0   :  { %10 = vsyncpa [#allocation3], 0  ;;  %s3811_s0 = inlined_call_operand.vmem [shape: f32[2,4,256], index: 0, kind: input, shape index: {}]   ;;  %s3812_s1 = inlined_call_operand.vmem [shape: f32[384,4], index: 1, kind: input, shape index: {}]   ;;  %s3813_s2 = inlined_call_operand.vmem [shape: f32[384,1], index: 2, kind: input, shape index: {}]   ;;  %s3814_s3 = inlined_call_operand.vmem [shape: f32[4,4,32], index: 3, kind: input, shape index: {}]   ;;  %s3815_s4 = inlined_call_operand.vmem [shape: f32[4,3], index: 4, kind: input, shape index: {}]   ;;  %s3816_s5 = inlined_call_operand.hbm [shape: f32[2,4,256], index: 5, kind: output, shape index: {}]  }
   0x1   :  { %12 = vsyncpa [#allocation3 + $0x1], 0  ;;  %s2727_s18 = smov 0   ;;  %s2729_s19 = smov 0  }
   0x2   :  { %s2731_s20 = smov 0   ;;  %s2733_s21 = smov 0  }
   0x3 LB: > { %s2748_s22 = sadd.s32 4294967295, %s2688_s21   ;;  %s2291_s23 = sadd.s32 4294967294, %s2688_s21   ;;  %s2688_s21 = sphi %s2733_s21, %s3880_s21   ;;  %s2684_s20 = sphi %s2731_s20, %s3879_s20   ;;  %s2680_s19 = sphi %s2729_s19, %s3878_s19   ;;  %s2676_s18 = sphi %s2727_s18, %s3877_s18  }
   0x4   : > { %s2752_s24 = sadd.s32 1, %s2688_s21   ;;  %s135_s25 = sadd.s32 1, %s2684_s20 }
   0x5   : > { %s132_s26 = ssub.s32 %s2688_s21, %s2752_s24  ;;  %p145_p0 = scmp.ne.s32.totalorder %s2684_s20, %s2680_s19 }
   0x6   : > { %p133_p1 = scmp.eq.s32.totalorder %s132_s26, 0  ;;  %p146_p2 = scmp.eq.s32.totalorder %s2748_s22, 1 }
   0x7   : > { %p151_p3 = scmp.ne.s32.totalorder %s2680_s19, %s2676_s18  ;;  %p152_p4 = scmp.eq.s32.totalorder %s2291_s23, 1 }
   0x8   : > { %s2763_s27 = scalar_select %p133_p1, %s2684_s20, %s135_s25  }
   0x9   : > { %p2765_p5 = por %p146_p2, %p145_p0  ;;  %p2769_p6 = por %p152_p4, %p151_p3 }
   0xa   : > { %p2294_p7 = scmp.ge.s32.totalorder %s2688_s21, 1  ;;  %p190_p8 = scmp.lt.s32.totalorder %s2688_s21, 3 }
   0xc   : > { %p191_p9 = pnand %p2294_p7, %p190_p8 }
   0xe   : > { %194 = sbr.rel (%p191_p9) target bundleno = 1925 (0x785), region = 40 }
  0x13   : > { %p218_p10 = scmp.lt.s32.totalorder %s2748_s22, 1  ;;  %vm229_vm0 = vcmask 1043456   ;;  %v3817_v24 = vmov 0   ;;  %s2691_s16 = smov 0.0   ;;  %v366_v26 = vld [vmem:[%s3813_s2 + $0x90] sm:$0xff]  ;;  %v367_v28 = vld [vmem:[%s3813_s2 + $0x98] sm:$0xff] }
  0x14   : > { %748 = vmatprep.mubr.bf16.mxu0 %v3817_v24  ;;  %2441 = vset.pattern.permute.xlu1 %v3817_v24  ;;  %v365_v29 = vld [vmem:[%s3813_s2 + $0x88] sm:$0xff]  ;;  %v370_v30 = vld [vmem:[%s3813_s2 + $0xb0] sm:$0xff]  ;;  %v371_v31 = vld [vmem:[%s3813_s2 + $0xb8] sm:$0xff]  ;;  %vm709_vm1 = vcmask 1041408   ;;  %vm636_vm2 = vcmask 31744   ;;  %vm2693_vm3 = vmmov 0  }
  0x15   : > { %s219_s30 = scalar_select %p218_p10, %s2748_s22, 1  ;;  %2442 = vset.pattern.permute.xlu0 %v3817_v24  ;;  %948 = vmatprep.mubr.bf16.mxu1 %v3817_v24  ;;  %v368_v32 = vld [vmem:[%s3813_s2 + $0xa0] sm:$0xff]  ;;  %v369_v33 = vld [vmem:[%s3813_s2 + $0xa8] sm:$0xff]  ;;  %v374_v34 = vld [vmem:[%s3813_s2 + $0xd0] sm:$0xff]  ;;  %vm1769_vm4 = vcmask 261120  }
  0x16   : > { %488 = vperm.xlu1 %2441, %v366_v26   ;;  %v375_v35 = vld [vmem:[%s3813_s2 + $0xd8] sm:$0xff]  ;;  %v372_v36 = vld [vmem:[%s3813_s2 + $0xc0] sm:$0xff]  ;;  %v373_v37 = vld [vmem:[%s3813_s2 + $0xc8] sm:$0xff]  ;;  %s215_s7 = sand.u32 1, %s2680_s19  }
  0x17   : > { %s2336_s6 = sshll.u32 %s219_s30, 3  ;;  %v378_v38 = vld [vmem:[%s3813_s2 + $0xf0] sm:$0xff]  ;;  %v379_v40 = vld [vmem:[%s3813_s2 + $0xf8] sm:$0xff]  ;;  %v377_v46 = vld [vmem:[%s3813_s2 + $0xe8] sm:$0xff]  ;;  %s2295_s8 = sshll.u32 %s215_s7, 3 }
  0x18   : > { %s222_s9 = scalar_lea.vmem %s3811_s0, %s2336_s6  ;;  %v271_v47 = vld [vmem:[%s3812_s1] sm:$0xff]  ;;  %v272_v48 = vld [vmem:[%s3812_s1 + $0x8] sm:$0xff]  ;;  %v382_v53 = vld [vmem:[%s3813_s2 + $0x110] sm:$0xff] }
  0x19   : > { %v2780_v0 = vld [vmem:[%s222_s9] sm:$0xff]  ;;  %v319_v52 = vpack.c.bf16 %v272_v48, %v271_v47  ;;  %v273_v55 = vld [vmem:[%s3812_s1 + $0x10] sm:$0xff]  ;;  %v274_v56 = vld [vmem:[%s3812_s1 + $0x18] sm:$0xff] }
  0x1a   : > { %v227_v1 = vcombine.high %v2780_v0, %v2780_v0  ;;  %v230_v2 = vsel %vm229_vm0, %v2780_v0, 0.0  ;;  %v242_v3 = vmul.f32 %v2780_v0, %v2780_v0  ;;  %493 = vperm.xlu1 %2441, %v367_v28   ;;  %v380_v50 = vld [vmem:[%s3813_s2 + $0x100] sm:$0xff]  ;;  %v320_v58 = vpack.c.bf16 %v274_v56, %v273_v55  ;;  %v276_v61 = vld [vmem:[%s3812_s1 + $0x28] sm:$0xff]  ;;  %v293_v26 = vld [vmem:[%s3812_s1 + $0xb0] sm:$0xff] }
  0x1b   : > { %v364_v54 = vld [vmem:[%s3813_s2 + $0x80] sm:$0xff]  ;;  %v381_v63 = vld [vmem:[%s3813_s2 + $0x108] sm:$0xff]  ;;  %v313_v56 = vld [vmem:[%s3812_s1 + $0x150] sm:$0xff] }
  0x1c   : > { %v231_v4 = vsel %vm229_vm0, %v227_v1, 0.0  ;;  %v244_v5 = vcombine.high %v242_v3, %v242_v3  ;;  %v246_v6 = vsel %vm229_vm0, %v242_v3, 0.0  ;;  %v384_v57 = vld [vmem:[%s3813_s2 + $0x120] sm:$0xff]  ;;  %v278_v1 = vld [vmem:[%s3812_s1 + $0x38] sm:$0xff]  ;;  %v308_v48 = vld [vmem:[%s3812_s1 + $0x128] sm:$0xff] }
  0x1d   : > { %v232_v7 = vadd.f32 %v231_v4, %v230_v2  ;;  %v376_v59 = vld [vmem:[%s3813_s2 + $0xe0] sm:$0xff]  ;;  %v383_v2 = vld [vmem:[%s3813_s2 + $0x118] sm:$0xff] }
  0x1e   : > { %v247_v8 = vsel %vm229_vm0, %v244_v5, 0.0  ;;  %483 = vperm.xlu1 %2441, %v365_v29   ;;  %v275_v60 = vld [vmem:[%s3812_s1 + $0x20] sm:$0xff]  ;;  %v280_v5 = vld [vmem:[%s3812_s1 + $0x48] sm:$0xff] }
  0x1f   : > { %233 = vadd.xlane.f32.xlu0 %v232_v7  ;;  %v248_v9 = vadd.f32 %v247_v8, %v246_v6  ;;  %v321_v62 = vpack.c.bf16 %v276_v61, %v275_v60  ;;  %v279_v4 = vld [vmem:[%s3812_s1 + $0x40] sm:$0xff]  ;;  %v281_v7 = vld [vmem:[%s3812_s1 + $0x50] sm:$0xff]  ;;  %v282_v8 = vld [vmem:[%s3812_s1 + $0x58] sm:$0xff] }
  0x20   : > { %v323_v6 = vpack.c.bf16 %v280_v5, %v279_v4  ;;  %v295_v29 = vld [vmem:[%s3812_s1 + $0xc0] sm:$0xff]  ;;  %v316_v60 = vld [vmem:[%s3812_s1 + $0x168] sm:$0xff] }
  0x21   : > { %v307_v47 = vld [vmem:[%s3812_s1 + $0x120] sm:$0xff] }
  0x22   : > { %508 = vperm.xlu1 %2441, %v370_v30   ;;  %v296_v30 = vld [vmem:[%s3812_s1 + $0xc8] sm:$0xff] }
  0x23   : > { %249 = vadd.xlane.f32.xlu0 %v248_v9  ;;  %v324_v9 = vpack.c.bf16 %v282_v8, %v281_v7 }
  0x26   : > { %513 = vperm.xlu1 %2441, %v371_v31   ;;  %v331_v31 = vpack.c.bf16 %v296_v30, %v295_v29 }
  0x2a   : > { %498 = vperm.xlu1 %2441, %v368_v32   ;;  %v297_v32 = vld [vmem:[%s3812_s1 + $0xd0] sm:$0xff] }
  0x2e   : > { %503 = vperm.xlu1 %2441, %v369_v33   ;;  %v298_v33 = vld [vmem:[%s3812_s1 + $0xd8] sm:$0xff] }
  0x32   : > { %528 = vperm.xlu1 %2441, %v374_v34   ;;  %v332_v34 = vpack.c.bf16 %v298_v33, %v297_v32 }
  0x36   : > { %533 = vperm.xlu1 %2441, %v375_v35   ;;  %v299_v35 = vld [vmem:[%s3812_s1 + $0xe0] sm:$0xff] }
  0x39   : > { %478 = vperm.xlu0 %2442, %v364_v54   ;;  %v312_v54 = vld [vmem:[%s3812_s1 + $0x148] sm:$0xff] }
  0x3a   : > { %518 = vperm.xlu1 %2441, %v372_v36   ;;  %v300_v36 = vld [vmem:[%s3812_s1 + $0xe8] sm:$0xff] }
  0x3d   : > { %538 = vperm.xlu0 %2442, %v376_v59   ;;  %v315_v59 = vld [vmem:[%s3812_s1 + $0x160] sm:$0xff] }
  0x3e   : > { %523 = vperm.xlu1 %2441, %v373_v37   ;;  %v333_v37 = vpack.c.bf16 %v300_v36, %v299_v35 }
  0x41   : > { %563 = vperm.xlu0 %2442, %v381_v63  }
  0x42   : > { %548 = vperm.xlu1 %2441, %v378_v38   ;;  %v301_v38 = vld [vmem:[%s3812_s1 + $0xf0] sm:$0xff] }
  0x45   : > { %573 = vperm.xlu0 %2442, %v383_v2   ;;  %v317_v2 = vld [vmem:[%s3812_s1 + $0x170] sm:$0xff] }
  0x46   : > { %553 = vperm.xlu1 %2441, %v379_v40  }
  0x4a   : > { %543 = vperm.xlu1 %2441, %v377_v46  }
  0x4e   : > { %558 = vperm.xlu1 %2441, %v380_v50   ;;  %v309_v50 = vld [vmem:[%s3812_s1 + $0x130] sm:$0xff] }
  0x52   : > { %568 = vperm.xlu1 %2441, %v382_v53   ;;  %v311_v53 = vld [vmem:[%s3812_s1 + $0x140] sm:$0xff] }
  0x53   : > { %v339_v55 = vpack.c.bf16 %v312_v54, %v311_v53 }
  0x56   : > { %578 = vperm.xlu1 %2441, %v384_v57   ;;  %v314_v57 = vld [vmem:[%s3812_s1 + $0x158] sm:$0xff] }
  0xa8   : > { %v234_v10 = vpop.xlane.xlu0 %233 }
  0xa9   : > { %v235_v11 = vrot.slane %v234_v10, 4 }
  0xab   : > { %v236_v12 = vadd.f32 %v235_v11, %v234_v10  ;;  %v283_v10 = vld [vmem:[%s3812_s1 + $0x60] sm:$0xff]  ;;  %v284_v11 = vld [vmem:[%s3812_s1 + $0x68] sm:$0xff] }
  0xac   : > { %v250_v13 = vpop.xlane.xlu0 %249 }
  0xad   : > { %v237_v14 = vrot.slane %v236_v12, 2  ;;  %v251_v15 = vrot.slane %v250_v13, 4 }
  0xaf   : > { %v252_v16 = vadd.f32 %v251_v15, %v250_v13  ;;  %v238_v17 = vadd.f32 %v237_v14, %v236_v12  ;;  %v325_v12 = vpack.c.bf16 %v284_v11, %v283_v10  ;;  %v285_v13 = vld [vmem:[%s3812_s1 + $0x70] sm:$0xff]  ;;  %v286_v14 = vld [vmem:[%s3812_s1 + $0x78] sm:$0xff] }
  0xb0   : > { %v326_v15 = vpack.c.bf16 %v286_v14, %v285_v13 }
  0xb1   : > { %v253_v18 = vrot.slane %v252_v16, 2  ;;  %v239_v19 = vrot.slane %v238_v17, 1 }
  0xb3   : > { %v240_v20 = vadd.f32 %v239_v19, %v238_v17  ;;  %v254_v21 = vadd.f32 %v253_v18, %v252_v16  ;;  %v287_v16 = vld [vmem:[%s3812_s1 + $0x80] sm:$0xff]  ;;  %v288_v17 = vld [vmem:[%s3812_s1 + $0x88] sm:$0xff]  ;;  %v289_v19 = vld [vmem:[%s3812_s1 + $0x90] sm:$0xff] }
  0xb4   : > { %v327_v18 = vpack.c.bf16 %v288_v17, %v287_v16 }
  0xb5   : > { %2384 = vpush %v240_v20  ;;  %v255_v22 = vrot.slane %v254_v21, 1  ;;  %v290_v20 = vld [vmem:[%s3812_s1 + $0x98] sm:$0xff] }
  0xb7   : > { %v256_v23 = vadd.f32 %v255_v22, %v254_v21  ;;  %v328_v21 = vpack.c.bf16 %v290_v20, %v289_v19  ;;  %v291_v22 = vld [vmem:[%s3812_s1 + $0xa0] sm:$0xff] }
  0xb9   : > { %2386 = vpush %v256_v23  ;;  %v292_v23 = vld [vmem:[%s3812_s1 + $0xa8] sm:$0xff] }
  0xe6   : > { %s2385_s10 = spop %2384 }
  0xe7   : > { %s2795_s11 = smul.f32 0.0009765625, %s2385_s10  ;;  %s217_s10 = scalar_lea.vmem [#allocation2], %s2295_s8 }
  0xe9   : > { %s260_s12 = smul.f32 %s2795_s11, %s2795_s11  ;;  %v263_v39 = vstv %s2795_s11 }
  0xea   : > { %s2387_s13 = spop %2386  ;;  %v264_v41 = vsub.f32 %v2780_v0, %v263_v39  ;;  %v277_v0 = vld [vmem:[%s3812_s1 + $0x30] sm:$0xff]  ;;  %v302_v39 = vld [vmem:[%s3812_s1 + $0xf8] sm:$0xff] }
  0xeb   : > { %s259_s14 = smul.f32 0.0009765625, %s2387_s13  ;;  %v322_v3 = vpack.c.bf16 %v278_v1, %v277_v0  ;;  %v334_v40 = vpack.c.bf16 %v302_v39, %v301_v38 }
  0xed   : > { %s261_s15 = ssub.f32 %s259_s14, %s260_s12  ;;  %s2232_s12 = sshll.u32 %s217_s10, 4  ;;  %s2233_s12 = int_to_ptr.vmem [resolvable:$true] %s2232_s12 }
  0xef   : > { %s262_s17 = smax.f32 %s2691_s16, %s261_s15 }
  0xf0   : > { %s265_s23 = sadd.f32 1e-05, %s262_s17 }
  0xf2   : > { %v266_v25 = vstv %s265_s23 }
  0xf3   : > { %2447 = vrsqrt.f32 %v266_v25  ;;  %v329_v25 = vpack.c.bf16 %v292_v23, %v291_v22 }
 0x100   : > { %v2448_v27 = vpop.eup %2447 }
 0x101   : > { %2388 = vpush %v2448_v27  ;;  %v294_v27 = vld [vmem:[%s3812_s1 + $0xb8] sm:$0xff] }
 0x102   : > { %v330_v28 = vpack.c.bf16 %v294_v27, %v293_v26 }
 0x132   : > { %s2389_s17 = spop %2388 }
 0x133   : > { %v269_v42 = vstv %s2389_s17 }
 0x134   : > { %v270_v43 = vmul.f32 %v269_v42, %v264_v41  ;;  %v303_v41 = vld [vmem:[%s3812_s1 + $0x100] sm:$0xff]  ;;  %v304_v42 = vld [vmem:[%s3812_s1 + $0x108] sm:$0xff] }
 0x136   : > { %v344_v44 = vcombine.high %v270_v43, %v270_v43  ;;  %v346_v45 = vpack.c.bf16 %v270_v43, %v270_v43  ;;  %v335_v43 = vpack.c.bf16 %v304_v42, %v303_v41 }
 0x138   : > { %v347_v49 = vpack.c.bf16 %v344_v44, %v344_v44  ;;  %v711_v51 = vsel %vm709_vm1, %v346_v45, 0  ;;  %v305_v44 = vld [vmem:[%s3812_s1 + $0x110] sm:$0xff]  ;;  %v306_v45 = vld [vmem:[%s3812_s1 + $0x118] sm:$0xff] }
 0x139   : > { %v336_v46 = vpack.c.bf16 %v306_v45, %v305_v44 }
 0x13a   : > { %2298 = vmatprep.subr.msk.bf16.mxu0 %vm709_vm1, %v347_v49  ;;  %2382 = vmatprep.subr.msk.bf16.mxu1 %vm709_vm1, %v347_v49  ;;  %v337_v49 = vpack.c.bf16 %v308_v48, %v307_v47 }
 0x13b   : > { %731 = vmatpush1.bf16.msra.mxu0 %v711_v51  ;;  %2383 = vmatpush1.bf16.msra.mxu1 %v711_v51  ;;  %v310_v51 = vld [vmem:[%s3812_s1 + $0x138] sm:$0xff] }
 0x13e   : > { %2299 = vmatmul.mubr.msk.bf16.vlgmr.msra.gmra.mxu0 %vm636_vm2, %v319_v52  ;;  %v338_v52 = vpack.c.bf16 %v310_v51, %v309_v50  ;;  %2319 = vmatmul.mubr.msk.bf16.vlgmr.msra.gmra.mxu1 %vm636_vm2, %v339_v55 }
 0x13f   : > { %758 = vmatprep.mubr.bf16.mxu0 %v3817_v24  ;;  %958 = vmatprep.mubr.bf16.mxu1 %v3817_v24 }
 0x146   : > { %2300 = vmatmul.mubr.msk.bf16.gmra.mxu0 %vm636_vm2, %v320_v58  ;;  %v340_v58 = vpack.c.bf16 %v314_v57, %v313_v56 }
 0x147   : > { %768 = vmatprep.mubr.bf16.mxu0 %v3817_v24 }
 0x148   : > { %2320 = vmatmul.mubr.msk.bf16.gmra.mxu1 %vm636_vm2, %v340_v58 }
 0x149   : > { %968 = vmatprep.mubr.bf16.mxu1 %v3817_v24 }
 0x14e   : > { %2301 = vmatmul.mubr.msk.bf16.gmra.mxu0 %vm636_vm2, %v321_v62  ;;  %v341_v62 = vpack.c.bf16 %v316_v60, %v315_v59 }
 0x14f   : > { %778 = vmatprep.mubr.bf16.mxu0 %v3817_v24 }
 0x150   : > { %2321 = vmatmul.mubr.msk.bf16.gmra.mxu1 %vm636_vm2, %v341_v62 }
 0x151   : > { %978 = vmatprep.mubr.bf16.mxu1 %v3817_v24 }
 0x156   : > { %2302 = vmatmul.mubr.msk.bf16.gmra.mxu0 %vm636_vm2, %v322_v3  ;;  %v318_v3 = vld [vmem:[%s3812_s1 + $0x178] sm:$0xff] }
 0x157   : > { %788 = vmatprep.mubr.bf16.mxu0 %v3817_v24  ;;  %v342_v5 = vpack.c.bf16 %v318_v3, %v317_v2 }
 0x159   : > { %2322 = vmatmul.mubr.msk.bf16.gmra.mxu1 %vm636_vm2, %v342_v5 }
 0x15e   : > { %2303 = vmatmul.mubr.msk.bf16.gmra.mxu0 %vm636_vm2, %v323_v6 }
 0x15f   : > { %798 = vmatprep.mubr.bf16.mxu0 %v3817_v24 }
 0x166   : > { %2304 = vmatmul.mubr.msk.bf16.gmra.mxu0 %vm636_vm2, %v324_v9 }
 0x167   : > { %808 = vmatprep.mubr.bf16.mxu0 %v3817_v24 }
 0x16e   : > { %2305 = vmatmul.mubr.msk.bf16.gmra.mxu0 %vm636_vm2, %v325_v12 }
 0x16f   : > { %818 = vmatprep.mubr.bf16.mxu0 %v3817_v24 }
 0x176   : > { %2306 = vmatmul.mubr.msk.bf16.gmra.mxu0 %vm636_vm2, %v326_v15 }
 0x177   : > { %828 = vmatprep.mubr.bf16.mxu0 %v3817_v24 }
 0x17e   : > { %2307 = vmatmul.mubr.msk.bf16.gmra.mxu0 %vm636_vm2, %v327_v18 }
 0x17f   : > { %838 = vmatprep.mubr.bf16.mxu0 %v3817_v24 }
 0x186   : > { %2308 = vmatmul.mubr.msk.bf16.gmra.mxu0 %vm636_vm2, %v328_v21  ;;  %v489_v21 = vpop.permute.xlu1 %488 }
 0x187   : > { %848 = vmatprep.mubr.bf16.mxu0 %v3817_v24 }
 0x18a   : > { %v494_v26 = vpop.permute.xlu1 %493 }
 0x18e   : > { %2309 = vmatmul.mubr.msk.bf16.gmra.mxu0 %vm636_vm2, %v329_v25  ;;  %v484_v30 = vpop.permute.xlu1 %483 }
 0x18f   : > { %858 = vmatprep.mubr.bf16.mxu0 %v3817_v24 }
 0x196   : > { %2310 = vmatmul.mubr.msk.bf16.gmra.mxu0 %vm636_vm2, %v330_v28 }
 0x197   : > { %868 = vmatprep.mubr.bf16.mxu0 %v3817_v24 }
 0x19e   : > { %2311 = vmatmul.mubr.msk.bf16.gmra.mxu0 %vm636_vm2, %v331_v31 }
 0x19f   : > { %878 = vmatprep.mubr.bf16.mxu0 %v3817_v24 }
 0x1a6   : > { %2312 = vmatmul.mubr.msk.bf16.gmra.mxu0 %vm636_vm2, %v332_v34  ;;  %v509_v34 = vpop.permute.xlu1 %508 }
 0x1a7   : > { %888 = vmatprep.mubr.bf16.mxu0 %v3817_v24 }
 0x1aa   : > { %v514_v38 = vpop.permute.xlu1 %513 }
 0x1ae   : > { %2313 = vmatmul.mubr.msk.bf16.gmra.mxu0 %vm636_vm2, %v333_v37 }
 0x1af   : > { %898 = vmatprep.mubr.bf16.mxu0 %v3817_v24 }
 0x1b6   : > { %2314 = vmatmul.mubr.msk.bf16.gmra.mxu0 %vm636_vm2, %v334_v40  ;;  %v479_v40 = vpop.permute.xlu0 %478 }
 0x1b7   : > { %908 = vmatprep.mubr.bf16.mxu0 %v3817_v24 }
 0x1be   : > { %2315 = vmatmul.mubr.msk.bf16.gmra.mxu0 %vm636_vm2, %v335_v43 }
 0x1bf   : > { %918 = vmatprep.mubr.bf16.mxu0 %v3817_v24 }
 0x1c6   : > { %2316 = vmatmul.mubr.msk.bf16.gmra.mxu0 %vm636_vm2, %v336_v46  ;;  %v499_v46 = vpop.permute.xlu1 %498 }
 0x1c7   : > { %928 = vmatprep.mubr.bf16.mxu0 %v3817_v24 }
 0x1ca   : > { %v504_v55 = vpop.permute.xlu1 %503 }
 0x1ce   : > { %2317 = vmatmul.mubr.msk.bf16.gmra.mxu0 %vm636_vm2, %v337_v49  ;;  %v529_v3 = vpop.permute.xlu1 %528 }
 0x1cf   : > { %938 = vmatprep.mubr.bf16.mxu0 %v3817_v24 }
 0x1d6   : > { %2318 = vmatmul.mubr.msk.bf16.gmra.mxu0 %vm636_vm2, %v338_v52 }
 0x1fe   : > { %v3046_v61 = vpop.f32.mrf.mxu0 }
 0x1ff   : > { %3821 = vst [vmem:[#allocation5_spill] sm:$0xff] %v3046_v61 }
 0x200   : > { %v3048_v63 = vpop.f32.mrf.mxu0 }
 0x201   : > { %3822 = vst [vmem:[#allocation6_spill] sm:$0xff] %v3048_v63 }
 0x202   : > { %v3052_v0 = vpop.f32.mrf.mxu0 }
 0x203   : > { %3823 = vst [vmem:[#allocation7_spill] sm:$0xff] %v3052_v0 }
 0x204   : > { %v3054_v1 = vpop.f32.mrf.mxu0 }
 0x205   : > { %3824 = vst [vmem:[#allocation8_spill] sm:$0xff] %v3054_v1 }
 0x206   : > { %v3062_v4 = vpop.f32.mrf.mxu0 }
 0x207   : > { %3825 = vst [vmem:[#allocation9_spill] sm:$0xff] %v3062_v4 }
 0x208   : > { %v3064_v6 = vpop.f32.mrf.mxu0 }
 0x209   : > { %3826 = vst [vmem:[#allocation10_spill] sm:$0xff] %v3064_v6 }
 0x20a   : > { %v3067_v7 = vpop.f32.mrf.mxu0 }
 0x20b   : > { %3827 = vst [vmem:[#allocation11_spill] sm:$0xff] %v3067_v7 }
 0x20c   : > { %v3069_v8 = vpop.f32.mrf.mxu0 }
 0x20d   : > { %3828 = vst [vmem:[#allocation12_spill] sm:$0xff] %v3069_v8 }
 0x20e   : > { %v3071_v9 = vpop.f32.mrf.mxu0 }
 0x210   : > { %v3073_v10 = vpop.f32.mrf.mxu0 }
 0x212   : > { %v3075_v11 = vpop.f32.mrf.mxu0 }
 0x214   : > { %v3077_v12 = vpop.f32.mrf.mxu0 }
 0x216   : > { %v3079_v13 = vpop.f32.mrf.mxu0 }
 0x218   : > { %v3081_v14 = vpop.f32.mrf.mxu0 }
 0x219   : > { %3829 = vst [vmem:[#allocation13_spill] sm:$0xff] %v3081_v14 }
 0x21a   : > { %v3083_v15 = vpop.f32.mrf.mxu0 }
 0x21b   : > { %3830 = vst [vmem:[#allocation14_spill] sm:$0xff] %v3083_v15 }
 0x21c   : > { %v3085_v16 = vpop.f32.mrf.mxu0 }
 0x21d   : > { %3831 = vst [vmem:[#allocation15_spill] sm:$0xff] %v3085_v16 }
 0x21e   : > { %v3087_v17 = vpop.f32.mrf.mxu0 }
 0x21f   : > { %3832 = vst [vmem:[#allocation16_spill] sm:$0xff] %v3087_v17 }
 0x220   : > { %v3089_v18 = vpop.f32.mrf.mxu0 }
 0x221   : > { %3833 = vst [vmem:[#allocation17_spill] sm:$0xff] %v3089_v18 }
 0x222   : > { %v3091_v19 = vpop.f32.mrf.mxu0 }
 0x223   : > { %3834 = vst [vmem:[#allocation18_spill] sm:$0xff] %v3091_v19 }
 0x224   : > { %v3093_v20 = vpop.f32.mrf.mxu0 }
 0x225   : > { %3835 = vst [vmem:[#allocation19_spill] sm:$0xff] %v3093_v20 }
 0x226   : > { %v3095_v22 = vpop.f32.mrf.mxu0 }
 0x227   : > { %3836 = vst [vmem:[#allocation20_spill] sm:$0xff] %v3095_v22 }
 0x228   : > { %v3097_v23 = vpop.f32.mrf.mxu0 }
 0x229   : > { %3837 = vst [vmem:[#allocation21_spill] sm:$0xff] %v3097_v23 }
 0x22a   : > { %v3099_v25 = vpop.f32.mrf.mxu0 }
 0x22b   : > { %3838 = vst [vmem:[#allocation22_spill] sm:$0xff] %v3099_v25 }
 0x22c   : > { %v3101_v27 = vpop.f32.mrf.mxu0 }
 0x22d   : > { %3839 = vst [vmem:[#allocation23_spill] sm:$0xff] %v3101_v27 }
 0x22e   : > { %v3103_v28 = vpop.f32.mrf.mxu0 }
 0x22f   : > { %3840 = vst [vmem:[#allocation24_spill] sm:$0xff] %v3103_v28 }
 0x230   : > { %v3105_v29 = vpop.f32.mrf.mxu0 }
 0x231   : > { %3841 = vst [vmem:[#allocation25_spill] sm:$0xff] %v3105_v29 }
 0x232   : > { %v3107_v31 = vpop.f32.mrf.mxu0 }
 0x233   : > { %3842 = vst [vmem:[#allocation26_spill] sm:$0xff] %v3107_v31 }
 0x234   : > { %v3109_v32 = vpop.f32.mrf.mxu0 }
 0x235   : > { %3843 = vst [vmem:[#allocation27_spill] sm:$0xff] %v3109_v32 }
 0x236   : > { %v3111_v33 = vpop.f32.mrf.mxu0 }
 0x237   : > { %3844 = vst [vmem:[#allocation28_spill] sm:$0xff] %v3111_v33 }
 0x238   : > { %v3113_v35 = vpop.f32.mrf.mxu0 }
 0x239   : > { %3845 = vst [vmem:[#allocation29_spill] sm:$0xff] %v3113_v35 }
 0x23a   : > { %v3115_v36 = vpop.f32.mrf.mxu0 }
 0x23b   : > { %3846 = vst [vmem:[#allocation30_spill] sm:$0xff] %v3115_v36 }
 0x23c   : > { %v3117_v37 = vpop.f32.mrf.mxu0 }
 0x23d   : > { %3847 = vst [vmem:[#allocation31_spill] sm:$0xff] %v3117_v37 }
 0x23e   : > { %v830_v39 = vpop.f32.mrf.mxu0 }
 0x23f   : > { %v3119_v42 = vadd.f32 %v830_v39, %v479_v40 }
 0x240   : > { %v832_v41 = vpop.f32.mrf.mxu0 }
 0x241   : > { %v3121_v43 = vadd.f32 %v832_v41, %v479_v40 }
 0x242   : > { %v834_v44 = vpop.f32.mrf.mxu0 }
 0x243   : > { %v1269_v45 = vmax.f32 %v3119_v42, %v3121_v43  ;;  %v3125_v48 = vadd.f32 %v834_v44, %v484_v30 }
 0x244   : > { %v836_v47 = vpop.f32.mrf.mxu0 }
 0x245   : > { %v3127_v49 = vadd.f32 %v836_v47, %v484_v30  ;;  %1270 = vmax.xlane.f32.xlu0 %v1269_v45  ;;  %v534_v45 = vpop.permute.xlu1 %533 }
 0x246   : > { %v840_v50 = vpop.f32.mrf.mxu0 }
 0x247   : > { %v1272_v51 = vmax.f32 %v3125_v48, %v3127_v49  ;;  %v3131_v53 = vadd.f32 %v840_v50, %v489_v21 }
 0x248   : > { %v842_v52 = vpop.f32.mrf.mxu0 }
 0x249   : > { %v3133_v54 = vadd.f32 %v842_v52, %v489_v21  ;;  %1273 = vmax.xlane.f32.xlu0 %v1272_v51 }
 0x24a   : > { %v844_v56 = vpop.f32.mrf.mxu0 }
 0x24b   : > { %v1275_v57 = vmax.f32 %v3131_v53, %v3133_v54  ;;  %v3137_v59 = vadd.f32 %v844_v56, %v494_v26 }
 0x24c   : > { %v846_v58 = vpop.f32.mrf.mxu0 }
 0x24d   : > { %v3139_v60 = vadd.f32 %v846_v58, %v494_v26  ;;  %1276 = vmax.xlane.f32.xlu0 %v1275_v57  ;;  %v519_v58 = vpop.permute.xlu1 %518 }
 0x24e   : > { %v850_v62 = vpop.f32.mrf.mxu0 }
 0x24f   : > { %v1278_v2 = vmax.f32 %v3137_v59, %v3139_v60  ;;  %v3143_v21 = vadd.f32 %v850_v62, %v499_v46 }
 0x250   : > { %v852_v5 = vpop.f32.mrf.mxu0 }
 0x251   : > { %v3145_v30 = vadd.f32 %v852_v5, %v499_v46  ;;  %1279 = vmax.xlane.f32.xlu1 %v1278_v2 }
 0x252   : > { %v854_v39 = vpop.f32.mrf.mxu0 }
 0x253   : > { %v1281_v40 = vmax.f32 %v3143_v21, %v3145_v30  ;;  %v3149_v44 = vadd.f32 %v854_v39, %v504_v55 }
 0x254   : > { %v856_v41 = vpop.f32.mrf.mxu0 }
 0x255   : > { %v3151_v26 = vadd.f32 %v856_v41, %v504_v55  ;;  %1282 = vmax.xlane.f32.xlu1 %v1281_v40 }
 0x256   : > { %v860_v47 = vpop.f32.mrf.mxu0 }
 0x257   : > { %v1284_v50 = vmax.f32 %v3149_v44, %v3151_v26  ;;  %v3155_v52 = vadd.f32 %v860_v47, %v509_v34  ;;  %v524_v47 = vpop.permute.xlu1 %523 }
 0x258   : > { %v862_v51 = vpop.f32.mrf.mxu0 }
 0x259   : > { %v3157_v46 = vadd.f32 %v862_v51, %v509_v34  ;;  %1285 = vmax.xlane.f32.xlu0 %v1284_v50 }
 0x25a   : > { %v864_v56 = vpop.f32.mrf.mxu0 }
 0x25b   : > { %v1287_v57 = vmax.f32 %v3155_v52, %v3157_v46  ;;  %v3161_v55 = vadd.f32 %v864_v56, %v514_v38 }
 0x25c   : > { %v866_v62 = vpop.f32.mrf.mxu0 }
 0x25d   : > { %v3163_v2 = vadd.f32 %v866_v62, %v514_v38  ;;  %1288 = vmax.xlane.f32.xlu1 %v1287_v57 }
 0x25e   : > { %v870_v5 = vpop.f32.mrf.mxu0 }
 0x25f   : > { %v1290_v39 = vmax.f32 %v3161_v55, %v3163_v2  ;;  %v3167_v41 = vadd.f32 %v870_v5, %v519_v58  ;;  %v549_v5 = vpop.permute.xlu1 %548 }
 0x260   : > { %v872_v40 = vpop.f32.mrf.mxu0 }
 0x261   : > { %v3169_v34 = vadd.f32 %v872_v40, %v519_v58  ;;  %1291 = vmax.xlane.f32.xlu0 %v1290_v39 }
 0x262   : > { %v874_v50 = vpop.f32.mrf.mxu0 }
 0x263   : > { %v1293_v51 = vmax.f32 %v3167_v41, %v3169_v34  ;;  %v3173_v24 = vadd.f32 %v874_v50, %v524_v47 }
 0x264   : > { %v876_v56 = vpop.f32.mrf.mxu0 }
 0x265   : > { %v3175_v38 = vadd.f32 %v876_v56, %v524_v47  ;;  %1294 = vmax.xlane.f32.xlu1 %v1293_v51  ;;  %v554_v51 = vpop.permute.xlu1 %553 }
 0x266   : > { %v880_v57 = vpop.f32.mrf.mxu0 }
 0x267   : > { %v1296_v62 = vmax.f32 %v3173_v24, %v3175_v38  ;;  %v3179_v58 = vadd.f32 %v880_v57, %v529_v3  ;;  %v539_v57 = vpop.permute.xlu0 %538 }
 0x268   : > { %v882_v36 = vpop.f32.mrf.mxu0 }
 0x269   : > { %v3181_v39 = vadd.f32 %v882_v36, %v529_v3  ;;  %1297 = vmax.xlane.f32.xlu0 %v1296_v62  ;;  %v544_v22 = vpop.permute.xlu1 %543 }
 0x26a   : > { %v884_v40 = vpop.f32.mrf.mxu0 }
 0x26b   : > { %v1299_v33 = vmax.f32 %v3179_v58, %v3181_v39  ;;  %v3185_v31 = vadd.f32 %v884_v40, %v534_v45 }
 0x26c   : > { %v886_v50 = vpop.f32.mrf.mxu0 }
 0x26d   : > { %v3187_v47 = vadd.f32 %v886_v50, %v534_v45  ;;  %1300 = vmax.xlane.f32.xlu1 %v1299_v33 }
 0x26e   : > { %v890_v56 = vpop.f32.mrf.mxu0 }
 0x26f   : > { %v1302_v28 = vmax.f32 %v3185_v31, %v3187_v47  ;;  %v3191_v36 = vadd.f32 %v890_v56, %v539_v57 }
 0x270   : > { %v892_v25 = vpop.f32.mrf.mxu0 }
 0x271   : > { %v3193_v3 = vadd.f32 %v892_v25, %v539_v57  ;;  %1303 = vmax.xlane.f32.xlu0 %v1302_v28 }
 0x272   : > { %v894_v62 = vpop.f32.mrf.mxu0 }
 0x273   : > { %v1305_v40 = vmax.f32 %v3191_v36, %v3193_v3  ;;  %v3197_v50 = vadd.f32 %v894_v62, %v544_v22 }
 0x274   : > { %v896_v45 = vpop.f32.mrf.mxu0 }
 0x275   : > { %v3199_v33 = vadd.f32 %v896_v45, %v544_v22  ;;  %1306 = vmax.xlane.f32.xlu1 %v1305_v40 }
 0x276   : > { %v900_v19 = vpop.f32.mrf.mxu0 }
 0x277   : > { %v1308_v17 = vmax.f32 %v3197_v50, %v3199_v33  ;;  %v3203_v27 = vadd.f32 %v900_v19, %v549_v5  ;;  %v559_v19 = vpop.permute.xlu1 %558 }
 0x278   : > { %v902_v56 = vpop.f32.mrf.mxu0 }
 0x279   : > { %v3205_v25 = vadd.f32 %v902_v56, %v549_v5  ;;  %1309 = vmax.xlane.f32.xlu0 %v1308_v17  ;;  %v564_v5 = vpop.permute.xlu0 %563 }
 0x27a   : > { %v904_v28 = vpop.f32.mrf.mxu0 }
 0x27b   : > { %v1311_v57 = vmax.f32 %v3203_v27, %v3205_v25  ;;  %v3209_v62 = vadd.f32 %v904_v28, %v554_v51 }
 0x27c   : > { %v906_v23 = vpop.f32.mrf.mxu0 }
 0x27d   : > { %v3211_v22 = vadd.f32 %v906_v23, %v554_v51  ;;  %1312 = vmax.xlane.f32.xlu1 %v1311_v57  ;;  %v386_v57 = vld [vmem:[%s3813_s2 + $0x130] sm:$0xff] }
 0x27e   : > { %v910_v40 = vpop.f32.mrf.mxu0 }
 0x27f   : > { %v1314_v45 = vmax.f32 %v3209_v62, %v3211_v22  ;;  %v3215_v17 = vadd.f32 %v910_v40, %v559_v19  ;;  %v385_v40 = vld [vmem:[%s3813_s2 + $0x128] sm:$0xff] }
 0x280   : > { %v912_v20 = vpop.f32.mrf.mxu0 }
 0x281   : > { %1315 = vmax.xlane.f32.xlu0 %v1314_v45  ;;  %v913_v8 = vadd.f32 %v912_v20, %v559_v19  ;;  %v3227_v45 = vpop.permute.xlu0 %573 }
 0x282   : > { %v914_v56 = vpop.f32.mrf.mxu0 }
 0x283   : > { %v3217_v18 = vadd.f32 %v914_v56, %v564_v5 }
 0x284   : > { %v916_v7 = vpop.f32.mrf.mxu0 }
 0x285   : > { %v917_v51 = vadd.f32 %v916_v7, %v564_v5  ;;  %v3231_v7 = vpop.permute.xlu1 %568 }
 0x287   : > { %v1510_v28 = vpack.c.bf16 %v917_v51, %v913_v8 }
 0x289   : > { %1573 = vmatprep.mubr.bf16.mxu1 %v1510_v28  ;;  %v3235_v4 = vpop.permute.xlu1 %578 }
 0x28e   : > { %588 = vperm.xlu1 %2441, %v386_v57  }
 0x297   : > { %583 = vperm.xlu0 %2442, %v385_v40  }
 0x2ce   : > { %v1271_v56 = vpop.xlane.xlu0 %1270 }
 0x2cf   : > { %v1317_v20 = vsub.f32 %v3119_v42, %v1271_v56  ;;  %v1318_v19 = vsub.f32 %v3121_v43, %v1271_v56 }
 0x2d1   : > { %v1349_v8 = vmul.f32 1.442695, %v1317_v20  ;;  %v1351_v5 = vmul.f32 1.442695, %v1318_v19 }
 0x2d2   : > { %v1274_v51 = vpop.xlane.xlu0 %1273 }
 0x2d3   : > { %2449 = vpow2.f32 %v1349_v8  ;;  %v1319_v28 = vsub.f32 %v3125_v48, %v1274_v51  ;;  %v1320_v57 = vsub.f32 %v3127_v49, %v1274_v51 }
 0x2d4   : > { %2451 = vpow2.f32 %v1351_v5 }
 0x2d5   : > { %v1353_v23 = vmul.f32 1.442695, %v1319_v28  ;;  %v1355_v40 = vmul.f32 1.442695, %v1320_v57 }
 0x2d6   : > { %v1277_v0 = vpop.xlane.xlu0 %1276 }
 0x2d7   : > { %2453 = vpow2.f32 %v1353_v23  ;;  %v1321_v42 = vsub.f32 %v3131_v53, %v1277_v0  ;;  %v1322_v43 = vsub.f32 %v3133_v54, %v1277_v0 }
 0x2d8   : > { %2455 = vpow2.f32 %v1355_v40 }
 0x2d9   : > { %v1357_v56 = vmul.f32 1.442695, %v1321_v42  ;;  %v1359_v20 = vmul.f32 1.442695, %v1322_v43 }
 0x2da   : > { %v1280_v19 = vpop.xlane.xlu1 %1279 }
 0x2db   : > { %2457 = vpow2.f32 %v1357_v56  ;;  %v1323_v48 = vsub.f32 %v3137_v59, %v1280_v19  ;;  %v1324_v49 = vsub.f32 %v3139_v60, %v1280_v19 }
 0x2dc   : > { %2459 = vpow2.f32 %v1359_v20 }
 0x2dd   : > { %v1361_v8 = vmul.f32 1.442695, %v1323_v48  ;;  %v1363_v5 = vmul.f32 1.442695, %v1324_v49 }
 0x2de   : > { %v1283_v51 = vpop.xlane.xlu1 %1282 }
 0x2df   : > { %2461 = vpow2.f32 %v1361_v8  ;;  %v1325_v23 = vsub.f32 %v3143_v21, %v1283_v51  ;;  %v1326_v53 = vsub.f32 %v3145_v30, %v1283_v51 }
 0x2e0   : > { %v3243_v28 = vpop.eup %2449  ;;  %2463 = vpow2.f32 %v1363_v5 }
 0x2e1   : > { %v3245_v0 = vpop.eup %2451  ;;  %v1365_v54 = vmul.f32 1.442695, %v1325_v23  ;;  %v1367_v57 = vmul.f32 1.442695, %v1326_v53 }
 0x2e2   : > { %v1286_v40 = vpop.xlane.xlu0 %1285  ;;  %v1413_v59 = vadd.f32 %v3245_v0, %v3243_v28 }
 0x2e3   : > { %2465 = vpow2.f32 %v1365_v54  ;;  %v1327_v60 = vsub.f32 %v3149_v44, %v1286_v40  ;;  %v1328_v42 = vsub.f32 %v3151_v26, %v1286_v40 }
 0x2e4   : > { %v3251_v43 = vpop.eup %2453  ;;  %2467 = vpow2.f32 %v1367_v57  ;;  %1414 = vadd.xlane.f32.xlu1 %v1413_v59 }
 0x2e5   : > { %v3253_v21 = vpop.eup %2455  ;;  %v1369_v30 = vmul.f32 1.442695, %v1327_v60  ;;  %v1371_v56 = vmul.f32 1.442695, %v1328_v42 }
 0x2e6   : > { %v1289_v20 = vpop.xlane.xlu1 %1288  ;;  %v1416_v19 = vadd.f32 %v3253_v21, %v3251_v43 }
 0x2e7   : > { %2469 = vpow2.f32 %v1369_v30  ;;  %v1329_v48 = vsub.f32 %v3155_v52, %v1289_v20  ;;  %v1330_v49 = vsub.f32 %v3157_v46, %v1289_v20 }
 0x2e8   : > { %v3259_v44 = vpop.eup %2457  ;;  %2471 = vpow2.f32 %v1371_v56  ;;  %1417 = vadd.xlane.f32.xlu0 %v1416_v19 }
 0x2e9   : > { %v3261_v26 = vpop.eup %2459  ;;  %v1373_v8 = vmul.f32 1.442695, %v1329_v48  ;;  %v1375_v5 = vmul.f32 1.442695, %v1330_v49 }
 0x2ea   : > { %v1292_v51 = vpop.xlane.xlu0 %1291  ;;  %v1419_v23 = vadd.f32 %v3261_v26, %v3259_v44 }
 0x2eb   : > { %2473 = vpow2.f32 %v1373_v8  ;;  %v1331_v53 = vsub.f32 %v3161_v55, %v1292_v51  ;;  %v1332_v54 = vsub.f32 %v3163_v2, %v1292_v51 }
 0x2ec   : > { %v3267_v52 = vpop.eup %2461  ;;  %2475 = vpow2.f32 %v1375_v5  ;;  %1420 = vadd.xlane.f32.xlu1 %v1419_v23 }
 0x2ed   : > { %v3269_v46 = vpop.eup %2463  ;;  %v1377_v57 = vmul.f32 1.442695, %v1331_v53  ;;  %v1379_v40 = vmul.f32 1.442695, %v1332_v54 }
 0x2ee   : > { %v1295_v59 = vpop.xlane.xlu1 %1294  ;;  %v1422_v60 = vadd.f32 %v3269_v46, %v3267_v52 }
 0x2ef   : > { %2477 = vpow2.f32 %v1377_v57  ;;  %v1333_v42 = vsub.f32 %v3167_v41, %v1295_v59  ;;  %v1334_v30 = vsub.f32 %v3169_v34, %v1295_v59 }
 0x2f0   : > { %v3275_v55 = vpop.eup %2465  ;;  %2479 = vpow2.f32 %v1379_v40  ;;  %1423 = vadd.xlane.f32.xlu0 %v1422_v60 }
 0x2f1   : > { %v3277_v2 = vpop.eup %2467  ;;  %v1381_v56 = vmul.f32 1.442695, %v1333_v42  ;;  %v1383_v20 = vmul.f32 1.442695, %v1334_v30 }
 0x2f2   : > { %v1298_v19 = vpop.xlane.xlu0 %1297  ;;  %v1425_v48 = vadd.f32 %v3277_v2, %v3275_v55 }
 0x2f3   : > { %2481 = vpow2.f32 %v1381_v56  ;;  %v1335_v49 = vsub.f32 %v3173_v24, %v1298_v19  ;;  %v1336_v8 = vsub.f32 %v3175_v38, %v1298_v19 }
 0x2f4   : > { %v3283_v41 = vpop.eup %2469  ;;  %2483 = vpow2.f32 %v1383_v20  ;;  %1426 = vadd.xlane.f32.xlu1 %v1425_v48 }
 0x2f5   : > { %v3285_v34 = vpop.eup %2471  ;;  %v1385_v5 = vmul.f32 1.442695, %v1335_v49  ;;  %v1387_v51 = vmul.f32 1.442695, %v1336_v8 }
 0x2f6   : > { %v1301_v23 = vpop.xlane.xlu1 %1300  ;;  %v1428_v53 = vadd.f32 %v3285_v34, %v3283_v41 }
 0x2f7   : > { %2485 = vpow2.f32 %v1385_v5  ;;  %v1337_v54 = vsub.f32 %v3179_v58, %v1301_v23  ;;  %v1338_v57 = vsub.f32 %v3181_v39, %v1301_v23 }
 0x2f8   : > { %v3291_v24 = vpop.eup %2473  ;;  %2487 = vpow2.f32 %v1387_v51  ;;  %1429 = vadd.xlane.f32.xlu0 %v1428_v53 }
 0x2f9   : > { %v3293_v38 = vpop.eup %2475  ;;  %v1389_v40 = vmul.f32 1.442695, %v1337_v54  ;;  %v1391_v59 = vmul.f32 1.442695, %v1338_v57 }
 0x2fa   : > { %v1304_v60 = vpop.xlane.xlu0 %1303  ;;  %v1431_v42 = vadd.f32 %v3293_v38, %v3291_v24 }
 0x2fb   : > { %2489 = vpow2.f32 %v1389_v40  ;;  %v1339_v30 = vsub.f32 %v3185_v31, %v1304_v60  ;;  %v1340_v56 = vsub.f32 %v3187_v47, %v1304_v60  ;;  %v388_v60 = vld [vmem:[%s3813_s2 + $0x140] sm:$0xff] }
 0x2fc   : > { %v3299_v58 = vpop.eup %2477  ;;  %2491 = vpow2.f32 %v1391_v59  ;;  %1432 = vadd.xlane.f32.xlu1 %v1431_v42  ;;  %v389_v42 = vld [vmem:[%s3813_s2 + $0x148] sm:$0xff] }
 0x2fd   : > { %v3301_v39 = vpop.eup %2479  ;;  %v1393_v20 = vmul.f32 1.442695, %v1339_v30  ;;  %v1395_v19 = vmul.f32 1.442695, %v1340_v56  ;;  %v387_v30 = vld [vmem:[%s3813_s2 + $0x138] sm:$0xff] }
 0x2fe   : > { %v1434_v48 = vadd.f32 %v3301_v39, %v3299_v58  ;;  %v1307_v56 = vpop.xlane.xlu1 %1306 }
 0x2ff   : > { %2493 = vpow2.f32 %v1393_v20 }
 0x300   : > { %v3305_v49 = vpop.eup %2481  ;;  %2495 = vpow2.f32 %v1395_v19  ;;  %1435 = vadd.xlane.f32.xlu0 %v1434_v48  ;;  %v1341_v19 = vsub.f32 %v3191_v36, %v1307_v56  ;;  %v1342_v48 = vsub.f32 %v3193_v3, %v1307_v56 }
 0x301   : > { %v3307_v8 = vpop.eup %2483 }
 0x302   : > { %v1437_v31 = vadd.f32 %v3307_v8, %v3305_v49  ;;  %v1310_v20 = vpop.xlane.xlu0 %1309  ;;  %v1399_v61 = vmul.f32 1.442695, %v1342_v48 }
 0x304   : > { %v3311_v47 = vpop.eup %2485  ;;  %1438 = vadd.xlane.f32.xlu1 %v1437_v31 }
 0x305   : > { %v3313_v5 = vpop.eup %2487 }
 0x306   : > { %v1440_v51 = vadd.f32 %v3313_v5, %v3311_v47  ;;  %v1313_v31 = vpop.xlane.xlu1 %1312 }
 0x307   : > { %v1346_v6 = vsub.f32 %v3205_v25, %v1313_v31 }
 0x308   : > { %v3317_v23 = vpop.eup %2489  ;;  %1441 = vadd.xlane.f32.xlu0 %v1440_v51  ;;  %v1343_v51 = vsub.f32 %v3197_v50, %v1310_v20 }
 0x309   : > { %v3319_v53 = vpop.eup %2491  ;;  %v1407_v56 = vmul.f32 1.442695, %v1346_v6 }
 0x30a   : > { %v1443_v54 = vadd.f32 %v3319_v53, %v3317_v23  ;;  %v1401_v1 = vmul.f32 1.442695, %v1343_v51  ;;  %v391_v51 = vld [vmem:[%s3813_s2 + $0x158] sm:$0xff] }
 0x30c   : > { %v3323_v57 = vpop.eup %2493  ;;  %1444 = vadd.xlane.f32.xlu1 %v1443_v54  ;;  %v1344_v54 = vsub.f32 %v3199_v33, %v1310_v20 }
 0x30d   : > { %v3325_v40 = vpop.eup %2495 }
 0x30e   : > { %v1446_v59 = vadd.f32 %v3325_v40, %v3323_v57  ;;  %v1403_v63 = vmul.f32 1.442695, %v1344_v54  ;;  %v393_v54 = vld [vmem:[%s3813_s2 + $0x168] sm:$0xff] }
 0x310   : > { %1447 = vadd.xlane.f32.xlu0 %v1446_v59  ;;  %v1316_v59 = vpop.xlane.xlu0 %1315 }
 0x311   : > { %v1348_v36 = vsub.f32 %v3211_v22, %v1316_v59 }
 0x313   : > { %v1411_v33 = vmul.f32 1.442695, %v1348_v36  ;;  %v394_v36 = vld [vmem:[%s3813_s2 + $0x170] sm:$0xff] }
 0x31d   : > { %598 = vperm.xlu1 %2441, %v388_v60   ;;  %v1397_v60 = vmul.f32 1.442695, %v1341_v19 }
 0x31f   : > { %2497 = vpow2.f32 %v1397_v60  ;;  %v395_v60 = vld [vmem:[%s3813_s2 + $0x178] sm:$0xff] }
 0x320   : > { %2499 = vpow2.f32 %v1399_v61 }
 0x321   : > { %603 = vperm.xlu1 %2441, %v389_v42   ;;  %v1345_v42 = vsub.f32 %v3203_v27, %v1313_v31  ;;  %2501 = vpow2.f32 %v1401_v1 }
 0x322   : > { %2503 = vpow2.f32 %v1403_v63 }
 0x323   : > { %v1405_v3 = vmul.f32 1.442695, %v1345_v42  ;;  %v392_v42 = vld [vmem:[%s3813_s2 + $0x160] sm:$0xff] }
 0x325   : > { %2505 = vpow2.f32 %v1405_v3  ;;  %v351_v3 = vld [vmem:[%s3813_s2 + $0x18] sm:$0xff] }
 0x326   : > { %593 = vperm.xlu0 %2442, %v387_v30   ;;  %v1347_v30 = vsub.f32 %v3209_v62, %v1316_v59  ;;  %2507 = vpow2.f32 %v1407_v56  ;;  %v390_v59 = vld [vmem:[%s3813_s2 + $0x150] sm:$0xff]  ;;  %v348_v56 = vld [vmem:[%s3813_s2] sm:$0xff] }
 0x328   : > { %v1409_v50 = vmul.f32 1.442695, %v1347_v30  ;;  %v349_v30 = vld [vmem:[%s3813_s2 + $0x8] sm:$0xff] }
 0x32a   : > { %2509 = vpow2.f32 %v1409_v50  ;;  %v353_v50 = vld [vmem:[%s3813_s2 + $0x28] sm:$0xff] }
 0x32b   : > { %2511 = vpow2.f32 %v1411_v33  ;;  %v350_v33 = vld [vmem:[%s3813_s2 + $0x10] sm:$0xff] }
 0x32c   : > { %v3346_v27 = vpop.eup %2497 }
 0x32d   : > { %v3348_v25 = vpop.eup %2499 }
 0x32e   : > { %v3350_v62 = vpop.eup %2501  ;;  %v1449_v63 = vadd.f32 %v3348_v25, %v3346_v27 }
 0x32f   : > { %v3352_v20 = vpop.eup %2503 }
 0x330   : > { %v1452_v6 = vadd.f32 %v3352_v20, %v3350_v62 }
 0x332   : > { %v3354_v22 = vpop.eup %2505 }
 0x333   : > { %v3356_v61 = vpop.eup %2507 }
 0x334   : > { %v1455_v48 = vadd.f32 %v3356_v61, %v3354_v22 }
 0x337   : > { %v3358_v1 = vpop.eup %2509 }
 0x338   : > { %v3364_v19 = vpop.eup %2511 }
 0x339   : > { %v1458_v31 = vadd.f32 %v3364_v19, %v3358_v1 }
 0x345   : > { %1450 = vadd.xlane.f32.xlu1 %v1449_v63  ;;  %1453 = vadd.xlane.f32.xlu0 %v1452_v6  ;;  %v3403_v63 = vpop.permute.xlu1 %588  ;;  %v3405_v6 = vpop.permute.xlu0 %583 }
 0x349   : > { %1456 = vadd.xlane.f32.xlu1 %v1455_v48  ;;  %1459 = vadd.xlane.f32.xlu0 %v1458_v31  ;;  %v355_v48 = vld [vmem:[%s3813_s2 + $0x38] sm:$0xff]  ;;  %v352_v31 = vld [vmem:[%s3813_s2 + $0x20] sm:$0xff] }
 0x35a   : > { %613 = vperm.xlu1 %2441, %v391_v51  }
 0x35e   : > { %623 = vperm.xlu1 %2441, %v393_v54  }
 0x35f   : > { %608 = vperm.xlu0 %2442, %v390_v59   ;;  %v357_v59 = vld [vmem:[%s3813_s2 + $0x48] sm:$0xff] }
 0x362   : > { %633 = vperm.xlu1 %2441, %v395_v60   ;;  %v354_v60 = vld [vmem:[%s3813_s2 + $0x30] sm:$0xff] }
 0x363   : > { %618 = vperm.xlu0 %2442, %v392_v42  }
 0x366   : > { %403 = vperm.xlu1 %2441, %v349_v30   ;;  %v359_v30 = vld [vmem:[%s3813_s2 + $0x58] sm:$0xff] }
 0x367   : > { %628 = vperm.xlu0 %2442, %v394_v36   ;;  %v356_v36 = vld [vmem:[%s3813_s2 + $0x40] sm:$0xff] }
 0x36a   : > { %413 = vperm.xlu1 %2441, %v351_v3  }
 0x36b   : > { %398 = vperm.xlu0 %2442, %v348_v56   ;;  %v361_v56 = vld [vmem:[%s3813_s2 + $0x68] sm:$0xff] }
 0x36d   : > { %v1415_v51 = vpop.xlane.xlu1 %1414 }
 0x36e   : > { %423 = vperm.xlu1 %2441, %v353_v50   ;;  %v3428_v50 = vpop.f32.mrf.mxu0 }
 0x36f   : > { %408 = vperm.xlu0 %2442, %v350_v33   ;;  %v358_v33 = vld [vmem:[%s3813_s2 + $0x50] sm:$0xff] }
 0x371   : > { %v1418_v54 = vpop.xlane.xlu0 %1417 }
 0x372   : > { %433 = vperm.xlu1 %2441, %v355_v48   ;;  %2513 = vrcp.f32 %v1418_v54  ;;  %v363_v48 = vld [vmem:[%s3813_s2 + $0x78] sm:$0xff] }
 0x373   : > { %418 = vperm.xlu0 %2442, %v352_v31   ;;  %v922_v31 = vpop.f32.mrf.mxu0 }
 0x375   : > { %v1421_v42 = vpop.xlane.xlu1 %1420 }
 0x376   : > { %443 = vperm.xlu1 %2441, %v357_v59   ;;  %2515 = vrcp.f32 %v1421_v42  ;;  %v3439_v42 = vpop.f32.mrf.mxu0 }
 0x377   : > { %428 = vperm.xlu0 %2442, %v354_v60   ;;  %2517 = vrcp.f32 %v1415_v51  ;;  %v360_v51 = vld [vmem:[%s3813_s2 + $0x60] sm:$0xff] }
 0x379   : > { %v1424_v3 = vpop.xlane.xlu0 %1423 }
 0x37a   : > { %2519 = vrcp.f32 %v1424_v3  ;;  %453 = vperm.xlu1 %2441, %v359_v30  }
 0x37b   : > { %438 = vperm.xlu0 %2442, %v356_v36   ;;  %v362_v36 = vld [vmem:[%s3813_s2 + $0x70] sm:$0xff] }
 0x37d   : > { %v1427_v54 = vpop.xlane.xlu1 %1426 }
 0x37e   : > { %463 = vperm.xlu1 %2441, %v361_v56  }
 0x37f   : > { %448 = vperm.xlu0 %2442, %v358_v33   ;;  %v2514_v59 = vpop.eup %2513 }
 0x380   : > { %v1480_v35 = vmul.f32 %v2514_v59, %v3253_v21 }
 0x381   : > { %v1430_v30 = vpop.xlane.xlu0 %1429 }
 0x382   : > { %473 = vperm.xlu1 %2441, %v363_v48   ;;  %2521 = vrcp.f32 %v1430_v30  ;;  %v926_v48 = vpop.f32.mrf.mxu0 }
 0x383   : > { %458 = vperm.xlu0 %2442, %v360_v51   ;;  %v2516_v60 = vpop.eup %2515  ;;  %v225_v51 = vld [vmem:[%s3815_s4] sm:$0xf] }
 0x384   : > { %v2518_v56 = vpop.eup %2517  ;;  %v1482_v37 = vmul.f32 %v2516_v60, %v3261_v26  ;;  %v1481_v29 = vmul.f32 %v2516_v60, %v3259_v44  ;;  %v3453_v21 = vpop.f32.mrf.mxu0 }
 0x385   : > { %v1433_v3 = vpop.xlane.xlu1 %1432  ;;  %v1478_v26 = vmul.f32 %v2518_v56, %v3245_v0 }
 0x386   : > { %2523 = vrcp.f32 %v1433_v3  ;;  %v932_v14 = vpop.f32.mrf.mxu0 }
 0x387   : > { %v2520_v33 = vpop.eup %2519  ;;  %468 = vperm.xlu0 %2442, %v362_v36   ;;  %2525 = vrcp.f32 %v1427_v54  ;;  %v1526_v3 = vpack.c.bf16 %v1480_v35, %v1478_v26  ;;  %v927_v35 = vadd.f32 %v926_v48, %v3227_v45 }
 0x388   : > { %v1484_v32 = vmul.f32 %v2520_v33, %v3269_v46  ;;  %v1483_v16 = vmul.f32 %v2520_v33, %v3267_v52  ;;  %v1479_v46 = vmul.f32 %v2514_v59, %v3251_v43  ;;  %v1477_v52 = vmul.f32 %v2518_v56, %v3243_v28  ;;  %v934_v54 = vpop.f32.mrf.mxu0 }
 0x389   : > { %v1436_v15 = vpop.xlane.xlu0 %1435  ;;  %v923_v56 = vadd.f32 %v922_v31, %v3231_v7 }
 0x38a   : > { %2527 = vrcp.f32 %v1436_v15  ;;  %v1528_v30 = vpack.c.bf16 %v1484_v32, %v1482_v37  ;;  %v1527_v36 = vpack.c.bf16 %v1483_v16, %v1481_v29  ;;  %v1525_v60 = vpack.c.bf16 %v1479_v46, %v1477_v52  ;;  %v936_v0 = vpop.f32.mrf.mxu0 }
 0x38b   : > { %2154 = vperm.xlu0 %2442, %v225_v51   ;;  %v1512_v46 = vpack.c.bf16 %v927_v35, %v923_v56  ;;  %v921_v52 = vadd.f32 %v3428_v50, %v3231_v7 }
 0x38c   : > { %1553 = vmatprep.subr.bf16.mxu1 %v1528_v30  ;;  %v940_v26 = vpop.f32.mrf.mxu0 }
 0x38d   : > { %1554 = vmatpush1.bf16.xpose.msra.mxu1 %v1527_v36  ;;  %v1439_v44 = vpop.xlane.xlu1 %1438 }
 0x38e   : > { %1555 = vmatprep.subr.bf16.mxu1 %v1526_v3  ;;  %v942_v31 = vpop.f32.mrf.mxu0 }
 0x38f   : > { %v2522_v15 = vpop.eup %2521 }
 0x390   : > { %v1488_v51 = vmul.f32 %v2522_v15, %v3285_v34 }
 0x391   : > { %v1442_v32 = vpop.xlane.xlu0 %1441 }
 0x392   : > { %2529 = vrcp.f32 %v1442_v32 }
 0x393   : > { %v2524_v16 = vpop.eup %2523 }
 0x394   : > { %v2526_v37 = vpop.eup %2525  ;;  %v1490_v43 = vmul.f32 %v2524_v16, %v3293_v38  ;;  %v1489_v36 = vmul.f32 %v2524_v16, %v3291_v24  ;;  %v3848_v38 = vpack.c.bf16 %v3217_v18, %v3215_v17  ;;  %v937_v24 = vadd.f32 %v936_v0, %v3405_v6 }
 0x395   : > { %v1445_v29 = vpop.xlane.xlu1 %1444  ;;  %1556 = vmatpush1.bf16.xpose.msra.mxu1 %v1525_v60  ;;  %v1486_v48 = vmul.f32 %v2526_v37, %v3277_v2  ;;  %v1487_v2 = vmul.f32 %v2522_v15, %v3283_v41  ;;  %v944_v60 = vpop.f32.mrf.mxu0  ;;  %v933_v18 = vadd.f32 %v932_v14, %v3235_v4  ;;  %v1485_v17 = vmul.f32 %v2526_v37, %v3275_v55 }
 0x396   : > { %2531 = vrcp.f32 %v1445_v29  ;;  %v935_v15 = vadd.f32 %v934_v54, %v3405_v6  ;;  %v931_v14 = vadd.f32 %v3453_v21, %v3235_v4 }
 0x397   : > { %v2528_v33 = vpop.eup %2527  ;;  %2533 = vrcp.f32 %v1439_v44  ;;  %v950_v44 = vpop.f32.mrf.mxu1  ;;  %v1514_v16 = vpack.c.bf16 %v937_v24, %v933_v18 }
 0x398   : > { %v1492_v28 = vmul.f32 %v2528_v33, %v3301_v39  ;;  %v1491_v59 = vmul.f32 %v2528_v33, %v3299_v58  ;;  %v1530_v39 = vpack.c.bf16 %v1488_v51, %v1486_v48  ;;  %v925_v58 = vadd.f32 %v3439_v42, %v3227_v45  ;;  %v946_v42 = vpop.f32.mrf.mxu0 }
 0x399   : > { %v1448_v30 = vpop.xlane.xlu0 %1447  ;;  %v952_v29 = vpop.f32.mrf.mxu1  ;;  %v1529_v33 = vpack.c.bf16 %v1487_v2, %v1485_v17  ;;  %v1513_v6 = vpack.c.bf16 %v935_v15, %v931_v14 }
 0x39a   : > { %2535 = vrcp.f32 %v1448_v30  ;;  %v1532_v3 = vpack.c.bf16 %v1492_v28, %v1490_v43  ;;  %v1531_v34 = vpack.c.bf16 %v1491_v59, %v1489_v36  ;;  %v1511_v32 = vpack.c.bf16 %v925_v58, %v921_v52  ;;  %v599_v7 = vpop.permute.xlu1 %598 }
 0x39b   : > { %v954_v51 = vpop.f32.mrf.mxu1  ;;  %v943_v30 = vadd.f32 %v942_v31, %v3403_v63  ;;  %v951_v31 = vadd.f32 %v950_v44, %v599_v7 }
 0x39c   : > { %1574 = vmatmul.mubr.bf16.vlgmr.msra.gmra.mxu1 %v3848_v38  ;;  %1602 = vmatprep.subr.bf16.mxu1 %v1532_v3 }
 0x39d   : > { %1581 = vmatprep.mubr.bf16.mxu1 %v1512_v46  ;;  %1603 = vmatpush1.bf16.xpose.msra.mxu1 %v1531_v34  ;;  %v956_v21 = vpop.f32.mrf.mxu1  ;;  %v953_v46 = vadd.f32 %v952_v29, %v599_v7 }
 0x39e   : > { %1604 = vmatprep.subr.bf16.mxu1 %v1530_v39  ;;  %v604_v48 = vpop.permute.xlu1 %603 }
 0x39f   : > { %v2530_v45 = vpop.eup %2529  ;;  %v955_v58 = vadd.f32 %v954_v51, %v604_v48  ;;  %v960_v2 = vpop.f32.mrf.mxu1 }
 0x3a0   : > { %v1496_v37 = vmul.f32 %v2530_v45, %v3313_v5 }
 0x3a1   : > { %v594_v35 = vpop.permute.xlu0 %593  ;;  %v1517_v24 = vpack.c.bf16 %v955_v58, %v951_v31  ;;  %v962_v52 = vpop.f32.mrf.mxu1 }
 0x3a2   : > { %v947_v55 = vadd.f32 %v946_v42, %v594_v35 }
 0x3a3   : > { %v2532_v0 = vpop.eup %2531 }
 0x3a4   : > { %1582 = vmatmul.mubr.bf16.gmra.mxu1 %v1511_v32  ;;  %v2534_v41 = vpop.eup %2533  ;;  %v1498_v43 = vmul.f32 %v2532_v0, %v3319_v53  ;;  %v1497_v59 = vmul.f32 %v2532_v0, %v3317_v23  ;;  %v1516_v4 = vpack.c.bf16 %v947_v55, %v943_v30  ;;  %v945_v53 = vadd.f32 %v944_v60, %v594_v35  ;;  %v964_v60 = vpop.f32.mrf.mxu1 }
 0x3a5   : > { %1605 = vmatpush1.bf16.xpose.msra.mxu1 %v1529_v33  ;;  %1622 = vmatprep.mubr.bf16.mxu1 %v1514_v16  ;;  %v1494_v3 = vmul.f32 %v2534_v41, %v3307_v8  ;;  %v957_v23 = vadd.f32 %v956_v21, %v604_v48  ;;  %v1493_v34 = vmul.f32 %v2534_v41, %v3305_v49 }
 0x3a6   : > { %v966_v18 = vpop.f32.mrf.mxu1 }
 0x3a7   : > { %v2536_v50 = vpop.eup %2535  ;;  %v1534_v5 = vpack.c.bf16 %v1496_v37, %v1494_v3  ;;  %v1518_v8 = vpack.c.bf16 %v957_v23, %v953_v46 }
 0x3a8   : > { %v1500_v28 = vmul.f32 %v2536_v50, %v3325_v40  ;;  %v1499_v56 = vmul.f32 %v2536_v50, %v3323_v57  ;;  %v1495_v57 = vmul.f32 %v2530_v45, %v3311_v47  ;;  %v941_v40 = vadd.f32 %v940_v26, %v3403_v63  ;;  %v970_v63 = vpop.f32.mrf.mxu1 }
 0x3aa   : > { %v1536_v54 = vpack.c.bf16 %v1500_v28, %v1498_v43  ;;  %v1535_v36 = vpack.c.bf16 %v1499_v56, %v1497_v59  ;;  %v1515_v38 = vpack.c.bf16 %v945_v53, %v941_v40  ;;  %v1533_v39 = vpack.c.bf16 %v1495_v57, %v1493_v34  ;;  %v972_v32 = vpop.f32.mrf.mxu1 }
 0x3ac   : > { %1623 = vmatmul.mubr.bf16.vlgmr.msra.gmra.mxu1 %v1513_v6  ;;  %1651 = vmatprep.subr.bf16.mxu1 %v1536_v54  ;;  %v974_v29 = vpop.f32.mrf.mxu1 }
 0x3ad   : > { %1630 = vmatprep.mubr.bf16.mxu1 %v1516_v4  ;;  %1652 = vmatpush1.bf16.xpose.msra.mxu1 %v1535_v36 }
 0x3ae   : > { %1653 = vmatprep.subr.bf16.mxu1 %v1534_v5  ;;  %v976_v41 = vpop.f32.mrf.mxu1 }
 0x3b0   : > { %v980_v5 = vpop.f32.mrf.mxu1 }
 0x3b2   : > { %v982_v40 = vpop.f32.mrf.mxu1 }
 0x3b4   : > { %1631 = vmatmul.mubr.bf16.gmra.mxu1 %v1515_v38 }
 0x3b5   : > { %1654 = vmatpush1.bf16.xpose.msra.mxu1 %v1533_v39  ;;  %1671 = vmatprep.mubr.bf16.mxu1 %v1518_v8 }
 0x3bc   : > { %1672 = vmatmul.mubr.bf16.vlgmr.msra.gmra.mxu1 %v1517_v24 }
 0x3ce   : > { %v1451_v47 = vpop.xlane.xlu1 %1450  ;;  %v1454_v17 = vpop.xlane.xlu0 %1453 }
 0x3cf   : > { %2537 = vrcp.f32 %v1451_v47 }
 0x3d0   : > { %2539 = vrcp.f32 %v1454_v17 }
 0x3d2   : > { %v1457_v49 = vpop.xlane.xlu1 %1456  ;;  %v1460_v26 = vpop.xlane.xlu0 %1459 }
 0x3d3   : > { %2541 = vrcp.f32 %v1457_v49 }
 0x3d4   : > { %2543 = vrcp.f32 %v1460_v26  ;;  %v3849_v26 = vld [vmem:[#allocation13_spill] sm:$0xff] }
 0x3d6   : > { %v614_v16 = vpop.permute.xlu1 %613 }
 0x3d7   : > { %v965_v45 = vadd.f32 %v964_v60, %v614_v16  ;;  %v967_v42 = vadd.f32 %v966_v18, %v614_v16 }
 0x3da   : > { %v624_v33 = vpop.permute.xlu1 %623  ;;  %v609_v44 = vpop.permute.xlu0 %608 }
 0x3db   : > { %v961_v35 = vadd.f32 %v960_v2, %v609_v44  ;;  %v963_v0 = vadd.f32 %v962_v52, %v609_v44  ;;  %v977_v51 = vadd.f32 %v976_v41, %v624_v33  ;;  %v2692_v2 = vmov 0.0   ;;  %v3851_v44 = vld [vmem:[#allocation15_spill] sm:$0xff] }
 0x3dc   : > { %v2538_v50 = vpop.eup %2537 }
 0x3dd   : > { %v1519_v15 = vpack.c.bf16 %v965_v45, %v961_v35  ;;  %v1520_v7 = vpack.c.bf16 %v967_v42, %v963_v0  ;;  %v2540_v37 = vpop.eup %2539  ;;  %v1502_v21 = vmul.f32 %v2538_v50, %v3348_v25 }
 0x3de   : > { %v3489_v14 = vpop.permute.xlu1 %633  ;;  %v619_v55 = vpop.permute.xlu0 %618  ;;  %v1504_v48 = vmul.f32 %v2540_v37, %v3352_v20 }
 0x3df   : > { %v973_v43 = vadd.f32 %v972_v32, %v619_v55  ;;  %1679 = vmatprep.mubr.bf16.mxu1 %v1520_v7  ;;  %v984_v20 = vpop.f32.mrf.mxu1  ;;  %v971_v39 = vadd.f32 %v970_v63, %v619_v55 }
 0x3e0   : > { %v2542_v28 = vpop.eup %2541  ;;  %1680 = vmatmul.mubr.bf16.gmra.mxu1 %v1519_v15  ;;  %v985_v0 = vadd.f32 %v984_v20, %v3489_v14 }
 0x3e1   : > { %v2544_v59 = vpop.eup %2543  ;;  %v1522_v56 = vpack.c.bf16 %v977_v51, %v973_v43  ;;  %v1506_v30 = vmul.f32 %v2542_v28, %v3356_v61  ;;  %v1505_v6 = vmul.f32 %v2542_v28, %v3354_v22  ;;  %v1538_v61 = vpack.c.bf16 %v1504_v48, %v1502_v21  ;;  %v986_v8 = vpop.f32.mrf.mxu1 }
 0x3e2   : > { %v3493_v54 = vpop.permute.xlu1 %403  ;;  %v629_v36 = vpop.permute.xlu0 %628  ;;  %v1508_v3 = vmul.f32 %v2544_v59, %v3364_v19  ;;  %v1507_v4 = vmul.f32 %v2544_v59, %v3358_v1  ;;  %v1501_v19 = vmul.f32 %v2538_v50, %v3346_v27  ;;  %v1503_v1 = vmul.f32 %v2540_v37, %v3350_v62 }
 0x3e3   : > { %1720 = vmatprep.mubr.bf16.mxu1 %v1522_v56  ;;  %v983_v27 = vadd.f32 %v982_v40, %v629_v36  ;;  %v975_v62 = vadd.f32 %v974_v29, %v624_v33  ;;  %v987_v47 = vadd.f32 %v986_v8, %v3489_v14 }
 0x3e4   : > { %v1540_v53 = vpack.c.bf16 %v1508_v3, %v1506_v30  ;;  %v1539_v23 = vpack.c.bf16 %v1507_v4, %v1505_v6  ;;  %v1537_v34 = vpack.c.bf16 %v1503_v1, %v1501_v19 }
 0x3e5   : > { %v1521_v49 = vpack.c.bf16 %v975_v62, %v971_v39  ;;  %v1524_v32 = vpack.c.bf16 %v987_v47, %v983_v27 }
 0x3e6   : > { %1700 = vmatprep.subr.bf16.mxu1 %v1540_v53  ;;  %v3499_v57 = vpop.permute.xlu0 %398  ;;  %v3501_v22 = vpop.permute.xlu1 %413 }
 0x3e7   : > { %1701 = vmatpush1.bf16.xpose.msra.mxu1 %v1539_v23 }
 0x3e8   : > { %1702 = vmatprep.subr.bf16.mxu1 %v1538_v61 }
 0x3ea   : > { %v3505_v25 = vpop.permute.xlu0 %408  ;;  %v424_v46 = vpop.permute.xlu1 %423 }
 0x3eb   : > { %v775_v58 = vadd.f32 %v3075_v11, %v424_v46  ;;  %v777_v52 = vadd.f32 %v3077_v12, %v424_v46  ;;  %v981_v12 = vadd.f32 %v980_v5, %v629_v36 }
 0x3ed   : > { %v1523_v7 = vpack.c.bf16 %v985_v0, %v981_v12 }
 0x3ee   : > { %v419_v38 = vpop.permute.xlu0 %418  ;;  %v434_v17 = vpop.permute.xlu1 %433 }
 0x3ef   : > { %1703 = vmatpush1.bf16.xpose.msra.mxu1 %v1537_v34  ;;  %v771_v31 = vadd.f32 %v3071_v9, %v419_v38  ;;  %v773_v24 = vadd.f32 %v3073_v10, %v419_v38  ;;  %v3850_v10 = vld [vmem:[#allocation14_spill] sm:$0xff]  ;;  %v3517_v45 = vadd.f32 %v3851_v44, %v434_v17  ;;  %v3852_v38 = vld [vmem:[#allocation25_spill] sm:$0xff] }
 0x3f0   : > { %2350 = vmatprep.subr.bf16.mxu1 %v2692_v2  ;;  %v785_v16 = vadd.f32 %v3850_v10, %v434_v17 }
 0x3f1   : > { %v1007_v60 = vmax.f32 %v771_v31, %v775_v58  ;;  %v1016_v63 = vmax.f32 %v773_v24, %v777_v52 }
 0x3f2   : > { %v429_v18 = vpop.permute.xlu0 %428  ;;  %v3525_v37 = vpop.permute.xlu1 %443 }
 0x3f3   : > { %v781_v11 = vadd.f32 %v3079_v13, %v429_v18  ;;  %v783_v9 = vadd.f32 %v3849_v26, %v429_v18 }
 0x3f5   : > { %v1008_v29 = vmax.f32 %v1007_v60, %v781_v11  ;;  %v1017_v33 = vmax.f32 %v1016_v63, %v783_v9  ;;  %v3855_v63 = vld [vmem:[#allocation31_spill] sm:$0xff] }
 0x3f6   : > { %1721 = vmatmul.mubr.bf16.vlgmr.msra.gmra.mxu1 %v1521_v49  ;;  %v3521_v15 = vpop.permute.xlu0 %438  ;;  %v3529_v36 = vpop.permute.xlu1 %453 }
 0x3f7   : > { %1728 = vmatprep.mubr.bf16.mxu1 %v1524_v32  ;;  %v1009_v42 = vmax.f32 %v1008_v29, %v785_v16  ;;  %v1018_v35 = vmax.f32 %v1017_v33, %v3517_v45 }
 0x3f9   : > { %v1010_v41 = vrot.slane %v1009_v42, 4  ;;  %v1019_v13 = vrot.slane %v1018_v35, 4 }
 0x3fa   : > { %v3527_v43 = vpop.permute.xlu0 %448  ;;  %v3533_v20 = vpop.permute.xlu1 %463 }
 0x3fb   : > { %v1011_v50 = vmax.f32 %v1009_v42, %v1010_v41  ;;  %v1020_v55 = vmax.f32 %v1018_v35, %v1019_v13 }
 0x3fd   : > { %v1012_v51 = vrot.slane %v1011_v50, 2  ;;  %v1021_v28 = vrot.slane %v1020_v55, 2 }
 0x3fe   : > { %1729 = vmatmul.mubr.bf16.gmra.mxu1 %v1523_v7  ;;  %v3531_v3 = vpop.permute.xlu0 %458  ;;  %v3543_v18 = vpop.permute.xlu1 %473 }
 0x3ff   : > { %2354 = vmatprep.mubr.msk.bf16.mxu1 %vm2693_vm3, %v2692_v2  ;;  %v1013_v59 = vmax.f32 %v1011_v50, %v1012_v51  ;;  %v1022_v14 = vmax.f32 %v1020_v55, %v1021_v28  ;;  %v813_v8 = vadd.f32 %v3852_v38, %v3531_v3 }
 0x401   : > { %v1014_v56 = vrot.slane %v1013_v59, 1  ;;  %v1023_v30 = vrot.slane %v1022_v14, 1 }
 0x402   : > { %v3535_v46 = vpop.permute.xlu0 %468 }
 0x403   : > { %v1015_v6 = vmax.f32 %v1013_v59, %v1014_v56  ;;  %v1024_v4 = vmax.f32 %v1022_v14, %v1023_v30 }
 0x405   : > { %v1069_v21 = vsub.f32 %v771_v31, %v1015_v6  ;;  %v1071_v48 = vsub.f32 %v775_v58, %v1015_v6  ;;  %v1073_v5 = vsub.f32 %v781_v11, %v1015_v6  ;;  %v1075_v53 = vsub.f32 %v785_v16, %v1015_v6  ;;  %v3853_v58 = vld [vmem:[#allocation27_spill] sm:$0xff] }
 0x406   : > { %v1070_v23 = vsub.f32 %v773_v24, %v1024_v4  ;;  %v1072_v19 = vsub.f32 %v777_v52, %v1024_v4  ;;  %v817_v27 = vadd.f32 %v3853_v58, %v3533_v20  ;;  %v3854_v24 = vld [vmem:[#allocation29_spill] sm:$0xff]  ;;  %v1074_v52 = vsub.f32 %v783_v9, %v1024_v4 }
 0x407   : > { %v1109_v61 = vmul.f32 1.442695, %v1069_v21  ;;  %v1113_v40 = vmul.f32 1.442695, %v1071_v48  ;;  %v1117_v1 = vmul.f32 1.442695, %v1073_v5  ;;  %v823_v62 = vadd.f32 %v3854_v24, %v3535_v46 }
 0x408   : > { %v1111_v34 = vmul.f32 1.442695, %v1070_v23  ;;  %v1121_v39 = vmul.f32 1.442695, %v1075_v53  ;;  %v1115_v31 = vmul.f32 1.442695, %v1072_v19  ;;  %v1052_v60 = vmax.f32 %v813_v8, %v817_v27 }
 0x409   : > { %2545 = vpow2.f32 %v1109_v61  ;;  %v1076_v17 = vsub.f32 %v3517_v45, %v1024_v4  ;;  %v1119_v49 = vmul.f32 1.442695, %v1074_v52  ;;  %v827_v11 = vadd.f32 %v3855_v63, %v3543_v18 }
 0x40a   : > { %2547 = vpow2.f32 %v1113_v40  ;;  %v1053_v47 = vmax.f32 %v1052_v60, %v823_v62 }
 0x40b   : > { %2549 = vpow2.f32 %v1117_v1  ;;  %v1123_v10 = vmul.f32 1.442695, %v1076_v17 }
 0x40c   : > { %2551 = vpow2.f32 %v1111_v34  ;;  %v1054_v26 = vmax.f32 %v1053_v47, %v827_v11 }
 0x40d   : > { %2553 = vpow2.f32 %v1121_v39 }
 0x40e   : > { %2555 = vpow2.f32 %v1115_v31  ;;  %v1055_v16 = vrot.slane %v1054_v26, 4 }
 0x40f   : > { %2557 = vpow2.f32 %v1119_v49 }
 0x410   : > { %v1056_v9 = vmax.f32 %v1054_v26, %v1055_v16  ;;  %2559 = vpow2.f32 %v1123_v10 }
 0x412   : > { %v1057_v12 = vrot.slane %v1056_v9, 2 }
 0x414   : > { %v1058_v41 = vmax.f32 %v1056_v9, %v1057_v12 }
 0x416   : > { %v2546_v32 = vpop.eup %2545  ;;  %v1059_v7 = vrot.slane %v1058_v41, 1 }
 0x417   : > { %v2548_v44 = vpop.eup %2547 }
 0x418   : > { %v1175_v29 = vadd.f32 %v2548_v44, %v2546_v32  ;;  %v2550_v33 = vpop.eup %2549  ;;  %v1060_v51 = vmax.f32 %v1058_v41, %v1059_v7 }
 0x419   : > { %v2552_v42 = vpop.eup %2551 }
 0x41a   : > { %v1176_v35 = vadd.f32 %v2550_v33, %v1175_v29  ;;  %v2554_v0 = vpop.eup %2553  ;;  %v1086_v59 = vsub.f32 %v813_v8, %v1060_v51  ;;  %v1088_v14 = vsub.f32 %v817_v27, %v1060_v51  ;;  %v1090_v56 = vsub.f32 %v823_v62, %v1060_v51 }
 0x41b   : > { %v2556_v45 = vpop.eup %2555  ;;  %v1092_v21 = vsub.f32 %v827_v11, %v1060_v51 }
 0x41c   : > { %v1177_v13 = vadd.f32 %v2554_v0, %v1176_v35  ;;  %v1184_v55 = vadd.f32 %v2556_v45, %v2552_v42  ;;  %v3548_v30 = vpop.eup %2557  ;;  %v1143_v48 = vmul.f32 1.442695, %v1086_v59  ;;  %v1147_v5 = vmul.f32 1.442695, %v1088_v14 }
 0x41d   : > { %v1151_v23 = vmul.f32 1.442695, %v1090_v56  ;;  %v3551_v61 = vpop.eup %2559  ;;  %v1155_v19 = vmul.f32 1.442695, %v1092_v21 }
 0x41e   : > { %v1178_v50 = vrot.slane %v1177_v13, 4  ;;  %v1185_v4 = vadd.f32 %v3548_v30, %v1184_v55  ;;  %2561 = vpow2.f32 %v1143_v48  ;;  %v3856_v55 = vld [vmem:[#allocation6_spill] sm:$0xff]  ;;  %v3861_v48 = vld [vmem:[#allocation9_spill] sm:$0xff] }
 0x41f   : > { %2563 = vpow2.f32 %v1147_v5  ;;  %v3584_v51 = vadd.f32 %v3856_v55, %v3499_v57  ;;  %v3606_v5 = vadd.f32 %v3861_v48, %v3505_v25  ;;  %v1761_v48 = vld [vmem:[%s3814_s3] sm:$0xf] }
 0x420   : > { %v1179_v28 = vadd.f32 %v1178_v50, %v1177_v13  ;;  %v1186_v1 = vadd.f32 %v3551_v61, %v1185_v4  ;;  %2565 = vpow2.f32 %v1151_v23  ;;  %v3860_v4 = vld [vmem:[#allocation7_spill] sm:$0xff] }
 0x421   : > { %v3602_v21 = vadd.f32 %v3860_v4, %v3493_v54 }
 0x422   : > { %v1180_v6 = vrot.slane %v1179_v28, 2  ;;  %v1187_v38 = vrot.slane %v1186_v1, 4 }
 0x424   : > { %v1181_v53 = vadd.f32 %v1180_v6, %v1179_v28  ;;  %v1188_v8 = vadd.f32 %v1187_v38, %v1186_v1  ;;  %v3857_v28 = vld [vmem:[#allocation8_spill] sm:$0xff] }
 0x425   : > { %v3588_v59 = vadd.f32 %v3857_v28, %v3493_v54  ;;  %v3863_v54 = vld [vmem:[#allocation11_spill] sm:$0xff] }
 0x426   : > { %v1182_v40 = vrot.slane %v1181_v53, 1  ;;  %v1189_v39 = vrot.slane %v1188_v8, 2  ;;  %v3619_v38 = vadd.f32 %v3863_v54, %v3501_v22 }
 0x427   : > { %v998_v6 = vmax.f32 %v3584_v51, %v3588_v59 }
 0x428   : > { %v1183_v34 = vadd.f32 %v1182_v40, %v1181_v53  ;;  %v1190_v31 = vadd.f32 %v1189_v39, %v1188_v8  ;;  %v3862_v40 = vld [vmem:[#allocation12_spill] sm:$0xff] }
 0x42a   : > { %2567 = vrcp.f32 %v1183_v34  ;;  %v1191_v58 = vrot.slane %v1190_v31, 1 }
 0x42b   : > { %2569 = vpow2.f32 %v1155_v19  ;;  %v2562_v27 = vpop.eup %2561 }
 0x42c   : > { %v2564_v24 = vpop.eup %2563  ;;  %v1192_v62 = vadd.f32 %v1191_v58, %v1190_v31 }
 0x42d   : > { %v1220_v52 = vadd.f32 %v2564_v24, %v2562_v27  ;;  %v3554_v60 = vpop.eup %2565 }
 0x42e   : > { %2571 = vrcp.f32 %v1192_v62 }
 0x42f   : > { %v1221_v47 = vadd.f32 %v3554_v60, %v1220_v52 }
 0x437   : > { %v2568_v17 = vpop.eup %2567 }
 0x438   : > { %v3557_v49 = vpop.eup %2569  ;;  %v3559_v63 = vmul.f32 %v2568_v17, %v2550_v33  ;;  %v3561_v11 = vmul.f32 %v2568_v17, %v2554_v0  ;;  %v3563_v26 = vmul.f32 %v2568_v17, %v2546_v32  ;;  %v3565_v10 = vmul.f32 %v2568_v17, %v2548_v44 }
 0x439   : > { %v1222_v16 = vadd.f32 %v3557_v49, %v1221_v47 }
 0x43a   : > { %v1952_v9 = vpack.c.bf16 %v3561_v11, %v3559_v63  ;;  %v1950_v29 = vpack.c.bf16 %v3565_v10, %v3563_v26 }
 0x43b   : > { %v1223_v12 = vrot.slane %v1222_v16, 4  ;;  %v3572_v41 = vpop.eup %2571 }
 0x43c   : > { %v3575_v33 = vmul.f32 %v3572_v41, %v2552_v42  ;;  %v3578_v32 = vmul.f32 %v3572_v41, %v2556_v45  ;;  %v3858_v42 = vld [vmem:[#allocation10_spill] sm:$0xff]  ;;  %v3859_v45 = vld [vmem:[#allocation5_spill] sm:$0xff] }
 0x43d   : > { %v1224_v35 = vadd.f32 %v1223_v12, %v1222_v16  ;;  %v3592_v14 = vadd.f32 %v3858_v42, %v3505_v25  ;;  %v3596_v56 = vadd.f32 %v3859_v45, %v3499_v57  ;;  %v3613_v57 = vadd.f32 %v3862_v40, %v3501_v22 }
 0x43e   : > { %v1951_v44 = vpack.c.bf16 %v3578_v32, %v3575_v33 }
 0x43f   : > { %v1225_v0 = vrot.slane %v1224_v35, 2  ;;  %v999_v53 = vmax.f32 %v998_v6, %v3592_v14  ;;  %v989_v23 = vmax.f32 %v3596_v56, %v3602_v21 }
 0x441   : > { %v1226_v13 = vadd.f32 %v1225_v0, %v1224_v35  ;;  %v990_v19 = vmax.f32 %v989_v23, %v3606_v5  ;;  %v1000_v34 = vmax.f32 %v999_v53, %v3613_v57 }
 0x443   : > { %v1227_v7 = vrot.slane %v1226_v13, 1  ;;  %v991_v39 = vmax.f32 %v990_v19, %v3619_v38  ;;  %v1001_v52 = vrot.slane %v1000_v34, 4 }
 0x445   : > { %v1228_v50 = vadd.f32 %v1227_v7, %v1226_v13  ;;  %v992_v16 = vrot.slane %v991_v39, 4  ;;  %v1002_v12 = vmax.f32 %v1000_v34, %v1001_v52  ;;  %v1765_v34 = vpack.c.bf16 %v1761_v48, %v1761_v48 }
 0x447   : > { %2573 = vrcp.f32 %v1228_v50  ;;  %v993_v0 = vmax.f32 %v991_v39, %v992_v16  ;;  %v1003_v7 = vrot.slane %v1002_v12, 2 }
 0x449   : > { %v994_v45 = vrot.slane %v993_v0, 2  ;;  %v1004_v6 = vmax.f32 %v1002_v12, %v1003_v7 }
 0x44b   : > { %v995_v40 = vmax.f32 %v993_v0, %v994_v45  ;;  %v1005_v54 = vrot.slane %v1004_v6, 1 }
 0x44d   : > { %v996_v39 = vrot.slane %v995_v40, 1 }
 0x454   : > { %v3621_v8 = vpop.eup %2573 }
 0x455   : > { %v3625_v58 = vmul.f32 %v3621_v8, %v2562_v27  ;;  %v3628_v62 = vmul.f32 %v3621_v8, %v2564_v24 }
 0x457   : > { %v1959_v17 = vpack.c.bf16 %v3628_v62, %v3625_v58 }
 0x45c   : > { %v1575_v1 = vpop.f32.mrf.mxu1 }
 0x45d   : > { %v1737_v4 = vmul.f32 0.17677669, %v1575_v1 }
 0x45e   : > { %v1577_v25 = vpop.f32.mrf.mxu1 }
 0x460   : > { %v1578_v31 = vpop.f32.mrf.mxu1 }
 0x461   : > { %v1738_v27 = vmul.f32 0.17677669, %v1578_v31  ;;  %v1006_v31 = vmax.f32 %v1004_v6, %v1005_v54  ;;  %v1762_v6 = vld [vmem:[%s3814_s3 + $0x4] sm:$0xf] }
 0x462   : > { %v1580_v47 = vpop.f32.mrf.mxu1 }
 0x463   : > { %v1753_v23 = vpack.c.bf16 %v1738_v27, %v1737_v4  ;;  %v997_v47 = vmax.f32 %v995_v40, %v996_v39  ;;  %v1064_v0 = vsub.f32 %v3588_v59, %v1006_v31  ;;  %v1066_v48 = vsub.f32 %v3592_v14, %v1006_v31 }
 0x464   : > { %v1583_v22 = vpop.f32.mrf.mxu1 }
 0x465   : > { %v1739_v50 = vmul.f32 0.17677669, %v1583_v22  ;;  %v1062_v22 = vsub.f32 %v3584_v51, %v1006_v31  ;;  %v1063_v27 = vsub.f32 %v3602_v21, %v997_v47  ;;  %v1099_v51 = vmul.f32 1.442695, %v1064_v0 }
 0x466   : > { %v1585_v35 = vpop.f32.mrf.mxu1  ;;  %v1067_v14 = vsub.f32 %v3619_v38, %v997_v47 }
 0x467   : > { %v1097_v40 = vmul.f32 1.442695, %v1063_v27 }
 0x468   : > { %v1586_v13 = vpop.f32.mrf.mxu1  ;;  %v1105_v39 = vmul.f32 1.442695, %v1067_v14 }
 0x469   : > { %v1740_v55 = vmul.f32 0.17677669, %v1586_v13 }
 0x46a   : > { %v1588_v28 = vpop.f32.mrf.mxu1 }
 0x46b   : > { %v1754_v42 = vpack.c.bf16 %v1740_v55, %v1739_v50  ;;  %v1061_v55 = vsub.f32 %v3596_v56, %v997_v47  ;;  %v1766_v56 = vpack.c.bf16 %v1762_v6, %v1762_v6 }
 0x46c   : > { %v1624_v24 = vpop.f32.mrf.mxu1 }
 0x46d   : > { %2351 = vmatpush3.bf16.msra.mxu1 %v1754_v42  ;;  %v1095_v42 = vmul.f32 1.442695, %v1062_v22  ;;  %v1741_v45 = vmul.f32 0.17677669, %v1624_v24  ;;  %v1065_v24 = vsub.f32 %v3606_v5, %v997_v47 }
 0x46e   : > { %v1626_v53 = vpop.f32.mrf.mxu1  ;;  %2352 = vmatprep.subr.bf16.mxu1 %v2692_v2 }
 0x46f   : > { %v1093_v53 = vmul.f32 1.442695, %v1061_v55  ;;  %2575 = vpow2.f32 %v1095_v42  ;;  %v1101_v54 = vmul.f32 1.442695, %v1065_v24 }
 0x470   : > { %v1627_v19 = vpop.f32.mrf.mxu1  ;;  %2577 = vpow2.f32 %v1099_v51 }
 0x471   : > { %2353 = vmatpush3.bf16.msra.mxu1 %v1753_v23  ;;  %v1742_v7 = vmul.f32 0.17677669, %v1627_v19  ;;  %v1068_v19 = vsub.f32 %v3613_v57, %v1006_v31  ;;  %2579 = vpow2.f32 %v1093_v53 }
 0x472   : > { %v1629_v25 = vpop.f32.mrf.mxu1  ;;  %2358 = vmatprep.subr.bf16.mxu1 %v2692_v2  ;;  %2581 = vpow2.f32 %v1097_v40 }
 0x473   : > { %v1755_v59 = vpack.c.bf16 %v1742_v7, %v1741_v45  ;;  %v1107_v25 = vmul.f32 1.442695, %v1068_v19  ;;  %v1763_v19 = vld [vmem:[%s3814_s3 + $0x8] sm:$0xf] }
 0x474   : > { %v1632_v1 = vpop.f32.mrf.mxu1  ;;  %2355 = vmatmul.mubr.msk.bf16.vlgmr.msra.gmra.mxu1 %vm1769_vm4, %v1765_v34  ;;  %v1103_v34 = vmul.f32 1.442695, %v1066_v48 }
 0x475   : > { %2362 = vmatprep.mubr.msk.bf16.mxu1 %vm2693_vm3, %v2692_v2  ;;  %v1743_v12 = vmul.f32 0.17677669, %v1632_v1 }
 0x476   : > { %v1634_v52 = vpop.f32.mrf.mxu1  ;;  %2583 = vpow2.f32 %v1103_v34 }
 0x477   : > { %2585 = vpow2.f32 %v1101_v54  ;;  %v1767_v54 = vpack.c.bf16 %v1763_v19, %v1763_v19 }
 0x478   : > { %v1635_v16 = vpop.f32.mrf.mxu1  ;;  %2587 = vpow2.f32 %v1107_v25 }
 0x479   : > { %v1744_v35 = vmul.f32 0.17677669, %v1635_v16  ;;  %2589 = vpow2.f32 %v1105_v39 }
 0x47a   : > { %v1637_v13 = vpop.f32.mrf.mxu1 }
 0x47b   : > { %v1756_v50 = vpack.c.bf16 %v1744_v35, %v1743_v12 }
 0x47c   : > { %v1673_v28 = vpop.f32.mrf.mxu1  ;;  %v3656_v1 = vpop.eup %2575 }
 0x47d   : > { %2359 = vmatpush3.bf16.msra.mxu1 %v1756_v50  ;;  %v3658_v5 = vpop.eup %2577  ;;  %v1745_v24 = vmul.f32 0.17677669, %v1673_v28 }
 0x47e   : > { %v1675_v4 = vpop.f32.mrf.mxu1  ;;  %2360 = vmatprep.subr.bf16.mxu1 %v2692_v2  ;;  %v3660_v57 = vpop.eup %2579  ;;  %v1166_v52 = vadd.f32 %v3658_v5, %v3656_v1 }
 0x47f   : > { %v3662_v31 = vpop.eup %2581 }
 0x480   : > { %v1676_v23 = vpop.f32.mrf.mxu1  ;;  %v1157_v38 = vadd.f32 %v3662_v31, %v3660_v57 }
 0x481   : > { %2361 = vmatpush3.bf16.msra.mxu1 %v1755_v59 }
 0x482   : > { %v1678_v21 = vpop.f32.mrf.mxu1  ;;  %2366 = vmatprep.subr.bf16.mxu1 %v2692_v2 }
 0x483   : > { %v2584_v16 = vpop.eup %2583 }
 0x484   : > { %2363 = vmatmul.mubr.msk.bf16.vlgmr.msra.gmra.mxu1 %vm1769_vm4, %v1766_v56  ;;  %v1167_v47 = vadd.f32 %v2584_v16, %v1166_v52  ;;  %v3668_v22 = vpop.eup %2585  ;;  %v1746_v56 = vmul.f32 0.17677669, %v1676_v23 }
 0x485   : > { %2370 = vmatprep.mubr.msk.bf16.mxu1 %vm2693_vm3, %v2692_v2  ;;  %v2588_v12 = vpop.eup %2587  ;;  %v1158_v35 = vadd.f32 %v3668_v22, %v1157_v38 }
 0x486   : > { %v1168_v0 = vadd.f32 %v2588_v12, %v1167_v47  ;;  %v2590_v13 = vpop.eup %2589  ;;  %v1757_v14 = vpack.c.bf16 %v1746_v56, %v1745_v24 }
 0x487   : > { %v1159_v7 = vadd.f32 %v2590_v13, %v1158_v35 }
 0x488   : > { %v1169_v50 = vrot.slane %v1168_v0, 4 }
 0x489   : > { %v1160_v27 = vrot.slane %v1159_v7, 4 }
 0x48a   : > { %v1170_v45 = vadd.f32 %v1169_v50, %v1168_v0 }
 0x48b   : > { %v1161_v51 = vadd.f32 %v1160_v27, %v1159_v7 }
 0x48c   : > { %v1171_v53 = vrot.slane %v1170_v45, 2 }
 0x48d   : > { %v1162_v21 = vrot.slane %v1161_v51, 2 }
 0x48e   : > { %v1172_v34 = vadd.f32 %v1171_v53, %v1170_v45  ;;  %v3866_v53 = vld [vmem:[#allocation21_spill] sm:$0xff] }
 0x48f   : > { %v1163_v25 = vadd.f32 %v1162_v21, %v1161_v51  ;;  %v3685_v56 = vadd.f32 %v3866_v53, %v3527_v43 }
 0x490   : > { %v1173_v39 = vrot.slane %v1172_v34, 1 }
 0x491   : > { %v1164_v23 = vrot.slane %v1163_v25, 1 }
 0x492   : > { %v1174_v28 = vadd.f32 %v1173_v39, %v1172_v34 }
 0x493   : > { %v1165_v52 = vadd.f32 %v1164_v23, %v1163_v25  ;;  %v1764_v25 = vld [vmem:[%s3814_s3 + $0xc] sm:$0xf] }
 0x494   : > { %2591 = vrcp.f32 %v1174_v28 }
 0x495   : > { %2593 = vrcp.f32 %v1165_v52 }
 0x4a0   : > { %v1681_v55 = vpop.f32.mrf.mxu1 }
 0x4a1   : > { %v1747_v4 = vmul.f32 0.17677669, %v1681_v55  ;;  %v2592_v27 = vpop.eup %2591 }
 0x4a2   : > { %v1683_v42 = vpop.f32.mrf.mxu1  ;;  %v2594_v24 = vpop.eup %2593  ;;  %v1242_v19 = vmul.f32 %v2592_v27, %v2584_v16  ;;  %v1244_v34 = vmul.f32 %v2592_v27, %v2588_v12  ;;  %v1238_v16 = vmul.f32 %v2592_v27, %v3656_v1  ;;  %v1240_v12 = vmul.f32 %v2592_v27, %v3658_v5 }
 0x4a3   : > { %v3864_v42 = vld [vmem:[#allocation17_spill] sm:$0xff]  ;;  %v1241_v28 = vmul.f32 %v2594_v24, %v3668_v22  ;;  %v1243_v52 = vmul.f32 %v2594_v24, %v2590_v13  ;;  %v1239_v22 = vmul.f32 %v2594_v24, %v3662_v31  ;;  %v1250_v1 = vmul.f32 %v3572_v41, %v3548_v30  ;;  %v3872_v30 = vld [vmem:[#allocation22_spill] sm:$0xff] }
 0x4a4   : > { %v1684_v6 = vpop.f32.mrf.mxu1  ;;  %v793_v45 = vadd.f32 %v3864_v42, %v3521_v15  ;;  %v1947_v42 = vpack.c.bf16 %v1240_v12, %v1238_v16  ;;  %v1252_v5 = vmul.f32 %v3572_v41, %v3551_v61  ;;  %v3869_v27 = vmov 0  }
 0x4a5   : > { %v1748_v59 = vmul.f32 0.17677669, %v1684_v6  ;;  %v805_v61 = vadd.f32 %v3872_v30, %v3529_v36 }
 0x4a6   : > { %v1686_v48 = vpop.f32.mrf.mxu1  ;;  %v1953_v53 = vpack.c.bf16 %v1252_v5, %v1250_v1 }
 0x4a7   : > { %v1758_v40 = vpack.c.bf16 %v1748_v59, %v1747_v4  ;;  %v3865_v59 = vld [vmem:[#allocation19_spill] sm:$0xff] }
 0x4a8   : > { %v797_v48 = vadd.f32 %v3865_v59, %v3525_v37 }
 0x4a9   : > { %2367 = vmatpush3.bf16.msra.mxu1 %v1758_v40 }
 0x4aa   : > { %2368 = vmatprep.subr.bf16.mxu1 %v2692_v2 }
 0x4ad   : > { %2369 = vmatpush3.bf16.msra.mxu1 %v1757_v14  ;;  %v1034_v14 = vmax.f32 %v793_v45, %v797_v48 }
 0x4ae   : > { %2374 = vmatprep.subr.bf16.mxu1 %v2692_v2 }
 0x4af   : > { %v1035_v39 = vmax.f32 %v1034_v14, %v3685_v56 }
 0x4b0   : > { %2371 = vmatmul.mubr.msk.bf16.vlgmr.msra.gmra.mxu1 %vm1769_vm4, %v1767_v54 }
 0x4b1   : > { %2378 = vmatprep.mubr.msk.bf16.mxu1 %vm2693_vm3, %v2692_v2 }
 0x4b6   : > { %v1722_v38 = vpop.f32.mrf.mxu1 }
 0x4b7   : > { %v1749_v54 = vmul.f32 0.17677669, %v1722_v38  ;;  %v3867_v38 = vld [vmem:[#allocation23_spill] sm:$0xff] }
 0x4b8   : > { %v1724_v47 = vpop.f32.mrf.mxu1 }
 0x4b9   : > { %v1949_v47 = vpack.c.bf16 %v1244_v34, %v1242_v19 }
 0x4ba   : > { %v1725_v35 = vpop.f32.mrf.mxu1 }
 0x4bb   : > { %v1750_v40 = vmul.f32 0.17677669, %v1725_v35  ;;  %v1768_v35 = vpack.c.bf16 %v1764_v25, %v1764_v25 }
 0x4bc   : > { %v1727_v0 = vpop.f32.mrf.mxu1 }
 0x4bd   : > { %v1759_v23 = vpack.c.bf16 %v1750_v40, %v1749_v54  ;;  %v807_v0 = vadd.f32 %v3867_v38, %v3529_v36 }
 0x4be   : > { %v1730_v7 = vpop.f32.mrf.mxu1 }
 0x4bf   : > { %v1751_v6 = vmul.f32 0.17677669, %v1730_v7  ;;  %v3868_v7 = vld [vmem:[#allocation16_spill] sm:$0xff]  ;;  %v1036_v13 = vmax.f32 %v1035_v39, %v807_v0 }
 0x4c0   : > { %v1732_v50 = vpop.f32.mrf.mxu1 }
 0x4c1   : > { %v1948_v50 = vpack.c.bf16 %v1243_v52, %v1241_v28  ;;  %v1037_v59 = vrot.slane %v1036_v13, 4 }
 0x4c2   : > { %v1733_v55 = vpop.f32.mrf.mxu1 }
 0x4c3   : > { %v1752_v51 = vmul.f32 0.17677669, %v1733_v55  ;;  %v1237_v55 = vmul.f32 %v2594_v24, %v3660_v57  ;;  %v3871_v57 = vld [vmem:[#allocation20_spill] sm:$0xff]  ;;  %v1038_v41 = vmax.f32 %v1036_v13, %v1037_v59 }
 0x4c4   : > { %v1735_v4 = vpop.f32.mrf.mxu1  ;;  %v3873_v13 = vld [vmem:[#allocation24_spill] sm:$0xff] }
 0x4c5   : > { %v1760_v21 = vpack.c.bf16 %v1752_v51, %v1751_v6  ;;  %v801_v51 = vadd.f32 %v3871_v57, %v3527_v43  ;;  %v1946_v31 = vpack.c.bf16 %v1239_v22, %v1237_v55  ;;  %v1039_v24 = vrot.slane %v1038_v41, 2 }
 0x4c7   : > { %2375 = vmatpush3.bf16.msra.mxu1 %v1760_v21  ;;  %v1040_v34 = vmax.f32 %v1038_v41, %v1039_v24 }
 0x4c8   : > { %2376 = vmatprep.subr.bf16.mxu1 %v2692_v2  ;;  %v791_v2 = vadd.f32 %v3868_v7, %v3521_v15  ;;  %v3870_v15 = vld [vmem:[#allocation18_spill] sm:$0xff] }
 0x4c9   : > { %v795_v6 = vadd.f32 %v3870_v15, %v3525_v37  ;;  %v1041_v14 = vrot.slane %v1040_v34, 1 }
 0x4cb   : > { %2377 = vmatpush3.bf16.msra.mxu1 %v1759_v23  ;;  %v1025_v4 = vmax.f32 %v791_v2, %v795_v6  ;;  %v1042_v43 = vmax.f32 %v1040_v34, %v1041_v14 }
 0x4cc   : > { %1977 = vmatprep.subr.bf16.mxu1 %v1949_v47 }
 0x4cd   : > { %v1026_v40 = vmax.f32 %v1025_v4, %v801_v51  ;;  %v1078_v39 = vsub.f32 %v793_v45, %v1042_v43  ;;  %v1080_v23 = vsub.f32 %v797_v48, %v1042_v43  ;;  %v1082_v16 = vsub.f32 %v3685_v56, %v1042_v43  ;;  %v3875_v56 = vld [vmem:[#allocation28_spill] sm:$0xff] }
 0x4ce   : > { %2379 = vmatmul.mubr.msk.bf16.vlgmr.msra.gmra.mxu1 %vm1769_vm4, %v1768_v35  ;;  %v1084_v12 = vsub.f32 %v807_v0, %v1042_v43  ;;  %v811_v45 = vadd.f32 %v3873_v13, %v3531_v3  ;;  %v821_v5 = vadd.f32 %v3875_v56, %v3535_v46 }
 0x4cf   : > { %1978 = vmatpush1.bf16.msra.mxu1 %v1948_v50  ;;  %1997 = vmatprep.mubr.bf16.mxu1 %v3869_v27  ;;  %v1027_v21 = vmax.f32 %v1026_v40, %v805_v61  ;;  %v1127_v52 = vmul.f32 1.442695, %v1078_v39  ;;  %v1131_v47 = vmul.f32 1.442695, %v1080_v23  ;;  %v1135_v38 = vmul.f32 1.442695, %v1082_v16 }
 0x4d0   : > { %1979 = vmatprep.subr.bf16.mxu1 %v1947_v42  ;;  %v1139_v55 = vmul.f32 1.442695, %v1084_v12  ;;  %v3874_v42 = vld [vmem:[#allocation26_spill] sm:$0xff] }
 0x4d1   : > { %v1028_v19 = vrot.slane %v1027_v21, 4  ;;  %2595 = vpow2.f32 %v1127_v52  ;;  %v815_v1 = vadd.f32 %v3874_v42, %v3533_v20 }
 0x4d2   : > { %2597 = vpow2.f32 %v1131_v47 }
 0x4d3   : > { %1980 = vmatpush1.bf16.msra.mxu1 %v1946_v31  ;;  %v1029_v37 = vmax.f32 %v1027_v21, %v1028_v19  ;;  %2599 = vpow2.f32 %v1135_v38 }
 0x4d4   : > { %2021 = vmatprep.subr.bf16.mxu1 %v1953_v53 }
 0x4d5   : > { %v1030_v54 = vrot.slane %v1029_v37, 2 }
 0x4d7   : > { %v1031_v25 = vmax.f32 %v1029_v37, %v1030_v54 }
 0x4d9   : > { %v1032_v28 = vrot.slane %v1031_v25, 1 }
 0x4db   : > { %v1033_v35 = vmax.f32 %v1031_v25, %v1032_v28 }
 0x4dd   : > { %v1077_v36 = vsub.f32 %v791_v2, %v1033_v35  ;;  %v1079_v7 = vsub.f32 %v795_v6, %v1033_v35  ;;  %v1081_v48 = vsub.f32 %v801_v51, %v1033_v35  ;;  %v1043_v2 = vmax.f32 %v811_v45, %v815_v1  ;;  %v3876_v51 = vld [vmem:[#allocation30_spill] sm:$0xff] }
 0x4de   : > { %v3720_v0 = vpop.eup %2595  ;;  %v1083_v6 = vsub.f32 %v805_v61, %v1033_v35  ;;  %v825_v4 = vadd.f32 %v3876_v51, %v3543_v18 }
 0x4df   : > { %v1125_v50 = vmul.f32 1.442695, %v1077_v36  ;;  %v1129_v22 = vmul.f32 1.442695, %v1079_v7  ;;  %v3722_v15 = vpop.eup %2597  ;;  %v1133_v57 = vmul.f32 1.442695, %v1081_v48  ;;  %v1044_v31 = vmax.f32 %v1043_v2, %v821_v5 }
 0x4e0   : > { %v1202_v3 = vadd.f32 %v3722_v15, %v3720_v0  ;;  %v1137_v20 = vmul.f32 1.442695, %v1083_v6  ;;  %v2600_v46 = vpop.eup %2599 }
 0x4e1   : > { %2601 = vpow2.f32 %v1125_v50  ;;  %v1045_v59 = vmax.f32 %v1044_v31, %v825_v4 }
 0x4e2   : > { %2603 = vpow2.f32 %v1139_v55  ;;  %v1203_v53 = vadd.f32 %v2600_v46, %v1202_v3 }
 0x4e3   : > { %2605 = vpow2.f32 %v1129_v22  ;;  %v1046_v30 = vrot.slane %v1045_v59, 4 }
 0x4e4   : > { %2607 = vpow2.f32 %v1133_v57 }
 0x4e5   : > { %2609 = vpow2.f32 %v1137_v20  ;;  %v1047_v24 = vmax.f32 %v1045_v59, %v1046_v30 }
 0x4e7   : > { %v1048_v18 = vrot.slane %v1047_v24, 2 }
 0x4e9   : > { %v1049_v25 = vmax.f32 %v1047_v24, %v1048_v18 }
 0x4eb   : > { %v1050_v28 = vrot.slane %v1049_v25, 1 }
 0x4ed   : > { %v1051_v35 = vmax.f32 %v1049_v25, %v1050_v28 }
 0x4ee   : > { %v3728_v40 = vpop.eup %2601 }
 0x4ef   : > { %v2604_v41 = vpop.eup %2603  ;;  %v1085_v12 = vsub.f32 %v811_v45, %v1051_v35  ;;  %v1087_v7 = vsub.f32 %v815_v1, %v1051_v35  ;;  %v1089_v48 = vsub.f32 %v821_v5, %v1051_v35  ;;  %v1091_v56 = vsub.f32 %v825_v4, %v1051_v35 }
 0x4f0   : > { %v3730_v21 = vpop.eup %2605  ;;  %v1204_v61 = vadd.f32 %v2604_v41, %v1203_v53 }
 0x4f1   : > { %v1193_v19 = vadd.f32 %v3730_v21, %v3728_v40  ;;  %v2608_v37 = vpop.eup %2607  ;;  %v1141_v55 = vmul.f32 1.442695, %v1085_v12  ;;  %v1145_v13 = vmul.f32 1.442695, %v1087_v7  ;;  %v1149_v2 = vmul.f32 1.442695, %v1089_v48 }
 0x4f2   : > { %v1205_v34 = vrot.slane %v1204_v61, 4  ;;  %v2610_v43 = vpop.eup %2609  ;;  %v1153_v57 = vmul.f32 1.442695, %v1091_v56 }
 0x4f3   : > { %v1194_v14 = vadd.f32 %v2608_v37, %v1193_v19 }
 0x4f4   : > { %v1206_v54 = vadd.f32 %v1205_v34, %v1204_v61 }
 0x4f5   : > { %v1195_v39 = vadd.f32 %v2610_v43, %v1194_v14 }
 0x4f6   : > { %v1207_v23 = vrot.slane %v1206_v54, 2 }
 0x4f7   : > { %v1196_v52 = vrot.slane %v1195_v39, 4 }
 0x4f8   : > { %v1208_v47 = vadd.f32 %v1207_v23, %v1206_v54 }
 0x4f9   : > { %v1197_v16 = vadd.f32 %v1196_v52, %v1195_v39 }
 0x4fa   : > { %v1209_v36 = vrot.slane %v1208_v47, 1 }
 0x4fb   : > { %v1198_v38 = vrot.slane %v1197_v16, 2 }
 0x4fc   : > { %v1210_v50 = vadd.f32 %v1209_v36, %v1208_v47 }
 0x4fd   : > { %v1199_v22 = vadd.f32 %v1198_v38, %v1197_v16 }
 0x4fe   : > { %2611 = vrcp.f32 %v1210_v50 }
 0x4ff   : > { %2613 = vpow2.f32 %v1141_v55  ;;  %v1200_v42 = vrot.slane %v1199_v22, 1 }
 0x500   : > { %2615 = vpow2.f32 %v1145_v13 }
 0x501   : > { %v1201_v6 = vadd.f32 %v1200_v42, %v1199_v22  ;;  %2617 = vpow2.f32 %v1149_v2 }
 0x503   : > { %2619 = vrcp.f32 %v1201_v6 }
 0x504   : > { %2621 = vpow2.f32 %v1153_v57 }
 0x50b   : > { %v2612_v31 = vpop.eup %2611 }
 0x50c   : > { %v2614_v1 = vpop.eup %2613  ;;  %v1258_v59 = vmul.f32 %v2612_v31, %v2600_v46  ;;  %v1260_v5 = vmul.f32 %v2612_v31, %v2604_v41  ;;  %v1254_v34 = vmul.f32 %v2612_v31, %v3720_v0  ;;  %v1256_v33 = vmul.f32 %v2612_v31, %v3722_v15 }
 0x50d   : > { %v2616_v20 = vpop.eup %2615  ;;  %v1268_v0 = vmul.f32 %v3621_v8, %v3557_v49 }
 0x50e   : > { %v1211_v53 = vadd.f32 %v2616_v20, %v2614_v1  ;;  %v1957_v61 = vpack.c.bf16 %v1260_v5, %v1258_v59  ;;  %v2618_v46 = vpop.eup %2617 }
 0x510   : > { %v1212_v41 = vadd.f32 %v2618_v46, %v1211_v53  ;;  %v2620_v24 = vpop.eup %2619 }
 0x511   : > { %v2622_v63 = vpop.eup %2621  ;;  %v1259_v19 = vmul.f32 %v2620_v24, %v2610_v43  ;;  %v1253_v54 = vmul.f32 %v2620_v24, %v3728_v40  ;;  %v1255_v26 = vmul.f32 %v2620_v24, %v3730_v21 }
 0x512   : > { %v1213_v11 = vadd.f32 %v2622_v63, %v1212_v41 }
 0x513   : > { %v1954_v25 = vpack.c.bf16 %v1255_v26, %v1253_v54 }
 0x514   : > { %v1214_v18 = vrot.slane %v1213_v11, 4 }
 0x516   : > { %v1215_v43 = vadd.f32 %v1214_v18, %v1213_v11 }
 0x518   : > { %v1216_v21 = vrot.slane %v1215_v43, 2 }
 0x51a   : > { %v1217_v23 = vadd.f32 %v1216_v21, %v1215_v43  ;;  %v2695_v21 = vmov 2  }
 0x51b   : > { %2444 = vset.pattern.permute.xlu1 %v2695_v21 }
 0x51c   : > { %v1218_v28 = vrot.slane %v1217_v23, 1 }
 0x51e   : > { %v1219_v52 = vadd.f32 %v1218_v28, %v1217_v23 }
 0x520   : > { %2623 = vrcp.f32 %v1219_v52 }
 0x534   : > { %v1807_v45 = vpop.f32.mrf.mxu1 }
 0x535   : > { %v1942_v3 = vpack.c.bf16 %v1807_v45, %v1807_v45 }
 0x536   : > { %v2356_v51 = vpop.f32.mrf.mxu1 }
 0x537   : > { %2327 = vmatmul.mubr.msk.bf16.vlgmr.msra.gmra.mxu1 %vm1769_vm4, %v1942_v3 }
 0x538   : > { %2022 = vmatpush1.bf16.msra.mxu1 %v1952_v9  ;;  %v1810_v4 = vpop.f32.mrf.mxu1  ;;  %2041 = vmatprep.mubr.bf16.mxu1 %v3869_v27  ;;  %v1257_v9 = vmul.f32 %v2620_v24, %v2608_v37  ;;  %v1266_v37 = vmul.f32 %v3621_v8, %v3554_v60  ;;  %v2624_v60 = vpop.eup %2623 }
 0x539   : > { %2023 = vmatprep.subr.bf16.mxu1 %v1951_v44  ;;  %v1265_v47 = vmul.f32 %v2624_v60, %v2618_v46  ;;  %v1267_v35 = vmul.f32 %v2624_v60, %v2622_v63  ;;  %v1261_v36 = vmul.f32 %v2624_v60, %v2614_v1  ;;  %v1263_v12 = vmul.f32 %v2624_v60, %v2616_v20 }
 0x53a   : > { %v2357_v30 = vpop.f32.mrf.mxu1  ;;  %v1956_v14 = vpack.c.bf16 %v1259_v19, %v1257_v9  ;;  %v1961_v39 = vpack.c.bf16 %v1268_v0, %v1266_v37 }
 0x53b   : > { %v1960_v16 = vpack.c.bf16 %v1267_v35, %v1265_v47  ;;  %v1958_v50 = vpack.c.bf16 %v1263_v12, %v1261_v36 }
 0x53c   : > { %2024 = vmatpush1.bf16.msra.mxu1 %v1950_v29  ;;  %v1955_v29 = vpack.c.bf16 %v1256_v33, %v1254_v34  ;;  %v2155_v34 = vpop.permute.xlu0 %2154 }
 0x53d   : > { %2065 = vmatprep.subr.bf16.mxu1 %v1957_v61 }
 0x544   : > { %v1850_v32 = vpop.f32.mrf.mxu1 }
 0x545   : > { %v1943_v44 = vpack.c.bf16 %v1850_v32, %v1850_v32 }
 0x546   : > { %v2364_v10 = vpop.f32.mrf.mxu1 }
 0x547   : > { %2328 = vmatmul.mubr.msk.bf16.vlgmr.msra.gmra.mxu1 %vm1769_vm4, %v1943_v44 }
 0x548   : > { %2066 = vmatpush1.bf16.msra.mxu1 %v1956_v14  ;;  %v1853_v15 = vpop.f32.mrf.mxu1  ;;  %2085 = vmatprep.mubr.bf16.mxu1 %v3869_v27 }
 0x549   : > { %2067 = vmatprep.subr.bf16.mxu1 %v1955_v29 }
 0x54a   : > { %v2365_v40 = vpop.f32.mrf.mxu1 }
 0x54b   : > { %v2694_v40 = vmov 1  }
 0x54c   : > { %2068 = vmatpush1.bf16.msra.mxu1 %v1954_v25  ;;  %2443 = vset.pattern.permute.xlu0 %v2694_v40 }
 0x54d   : > { %2109 = vmatprep.subr.bf16.mxu1 %v1961_v39  ;;  %v2627_v39 = vld [vmem:[%s3815_s4] sm:$0xf] }
 0x570   : > { %v1893_v49 = vpop.f32.mrf.mxu1 }
 0x571   : > { %v1944_v8 = vpack.c.bf16 %v1893_v49, %v1893_v49 }
 0x572   : > { %v2372_v38 = vpop.f32.mrf.mxu1 }
 0x573   : > { %2329 = vmatmul.mubr.msk.bf16.vlgmr.msra.gmra.mxu1 %vm1769_vm4, %v1944_v8 }
 0x574   : > { %2110 = vmatpush1.bf16.msra.mxu1 %v1960_v16  ;;  %v1896_v7 = vpop.f32.mrf.mxu1  ;;  %2129 = vmatprep.mubr.bf16.mxu1 %v3869_v27 }
 0x575   : > { %2111 = vmatprep.subr.bf16.mxu1 %v1959_v17 }
 0x576   : > { %v2373_v55 = vpop.f32.mrf.mxu1 }
 0x578   : > { %2112 = vmatpush1.bf16.msra.mxu1 %v1958_v50 }
 0x58e   : > { %v1936_v22 = vpop.f32.mrf.mxu1 }
 0x58f   : > { %v1945_v13 = vpack.c.bf16 %v1936_v22, %v1936_v22 }
 0x590   : > { %v2380_v48 = vpop.f32.mrf.mxu1 }
 0x591   : > { %2330 = vmatmul.mubr.msk.bf16.vlgmr.msra.gmra.mxu1 %vm1769_vm4, %v1945_v13 }
 0x592   : > { %v1939_v42 = vpop.f32.mrf.mxu1 }
 0x594   : > { %v2381_v56 = vpop.f32.mrf.mxu1 }
 0x5f7   : > { %v1999_v2 = vpop.f32.mrf.mxu1 }
 0x5f8   : > { %v2138_v27 = vsel %vm229_vm0, %v1999_v2, 0.0 }
 0x5f9   : > { %v2001_v6 = vpop.f32.mrf.mxu1 }
 0x5fa   : > { %v2145_v58 = vsel %vm229_vm0, %v2001_v6, 0.0 }
 0x5fb   : > { %v2003_v57 = vpop.f32.mrf.mxu1 }
 0x5fd   : > { %v2004_v31 = vpop.f32.mrf.mxu1 }
 0x607   : > { %v2043_v45 = vpop.f32.mrf.mxu1 }
 0x608   : > { %v2139_v62 = vsel %vm229_vm0, %v2043_v45, 0.0 }
 0x609   : > { %v2140_v17 = vadd.f32 %v2139_v62, %v2138_v27  ;;  %v2045_v3 = vpop.f32.mrf.mxu1 }
 0x60a   : > { %v2146_v1 = vsel %vm229_vm0, %v2045_v3, 0.0 }
 0x60b   : > { %v2147_v51 = vadd.f32 %v2146_v1, %v2145_v58  ;;  %v2047_v20 = vpop.f32.mrf.mxu1 }
 0x60d   : > { %v2048_v59 = vpop.f32.mrf.mxu1 }
 0x633   : > { %v2087_v5 = vpop.f32.mrf.mxu1 }
 0x634   : > { %v2141_v61 = vsel %vm229_vm0, %v2087_v5, 0.0 }
 0x635   : > { %v2089_v4 = vpop.f32.mrf.mxu1  ;;  %v2142_v41 = vadd.f32 %v2141_v61, %v2140_v17 }
 0x636   : > { %v2148_v46 = vsel %vm229_vm0, %v2089_v4, 0.0 }
 0x637   : > { %v2091_v53 = vpop.f32.mrf.mxu1  ;;  %v2149_v11 = vadd.f32 %v2148_v46, %v2147_v51 }
 0x639   : > { %v2092_v30 = vpop.f32.mrf.mxu1 }
 0x651   : > { %v2131_v24 = vpop.f32.mrf.mxu1 }
 0x652   : > { %v2143_v63 = vsel %vm229_vm0, %v2131_v24, 0.0 }
 0x653   : > { %v2144_v9 = vadd.f32 %v2143_v63, %v2142_v41  ;;  %v2133_v19 = vpop.f32.mrf.mxu1 }
 0x654   : > { %v2150_v33 = vsel %vm229_vm0, %v2133_v19, 0.0 }
 0x655   : > { %v2157_v32 = vadd.f32 %v2155_v34, %v2144_v9  ;;  %v2151_v44 = vadd.f32 %v2150_v33, %v2149_v11  ;;  %v2135_v18 = vpop.f32.mrf.mxu1 }
 0x657   : > { %v2158_v14 = vadd.f32 %v2155_v34, %v2151_v44  ;;  %v2136_v54 = vpop.f32.mrf.mxu1  ;;  %v2171_v26 = vmul.f32 %v2157_v32, %v2157_v32  ;;  %v2159_v10 = vsel %vm229_vm0, %v2157_v32, 0.0 }
 0x659   : > { %v2160_v29 = vsel %vm229_vm0, %v2158_v14, 0.0  ;;  %v2172_v37 = vmul.f32 %v2158_v14, %v2158_v14  ;;  %v2173_v15 = vsel %vm229_vm0, %v2171_v26, 0.0 }
 0x65a   : > { %v2161_v0 = vadd.f32 %v2160_v29, %v2159_v10 }
 0x65b   : > { %v2174_v43 = vsel %vm229_vm0, %v2172_v37, 0.0 }
 0x65c   : > { %2162 = vadd.xlane.f32.xlu1 %v2161_v0  ;;  %v2175_v25 = vadd.f32 %v2174_v43, %v2173_v15 }
 0x65e   : > { %2176 = vadd.xlane.f32.xlu0 %v2175_v25 }
 0x66d   : > { %2207 = vperm.xlu1 %2444, %v2627_v39  }
 0x674   : > { %2201 = vperm.xlu0 %2443, %v2627_v39  }
 0x678   : > { %2445 = vset.pattern.permute.xlu0 %v2695_v21 }
 0x6e5   : > { %v2163_v23 = vpop.xlane.xlu1 %2162 }
 0x6e6   : > { %v2164_v28 = vrot.slane %v2163_v23, 4 }
 0x6e7   : > { %v2177_v52 = vpop.xlane.xlu0 %2176 }
 0x6e8   : > { %v2165_v60 = vadd.f32 %v2164_v28, %v2163_v23  ;;  %v2178_v47 = vrot.slane %v2177_v52, 4 }
 0x6e9   : > { %v2208_v31 = vpop.permute.xlu1 %2207 }
 0x6ea   : > { %v2166_v35 = vrot.slane %v2165_v60, 2  ;;  %v2179_v49 = vadd.f32 %v2178_v47, %v2177_v52 }
 0x6ec   : > { %v2180_v8 = vrot.slane %v2179_v49, 2  ;;  %v2167_v16 = vadd.f32 %v2166_v35, %v2165_v60 }
 0x6ee   : > { %v2168_v36 = vrot.slane %v2167_v16, 1  ;;  %v2181_v12 = vadd.f32 %v2180_v8, %v2179_v49 }
 0x6ef   : > { %v2202_v2 = vpop.permute.xlu0 %2201 }
 0x6f0   : > { %v2169_v38 = vadd.f32 %v2168_v36, %v2167_v16  ;;  %v2182_v7 = vrot.slane %v2181_v12, 1 }
 0x6f2   : > { %2390 = vpush %v2169_v38  ;;  %v2183_v50 = vadd.f32 %v2182_v7, %v2181_v12 }
 0x6f4   : > { %2392 = vpush %v2183_v50 }
 0x723   : > { %s2391_s15 = spop %2390 }
 0x724   : > { %s2185_s17 = smul.f32 0.0009765625, %s2391_s15 }
 0x725   : > { %s2393_s23 = spop %2392 }
 0x726   : > { %s2187_s25 = smul.f32 %s2185_s17, %s2185_s17  ;;  %v2190_v13 = vstv %s2185_s17  ;;  %s2218_s17 = scalar_lea.sflag [#allocation3], %s215_s7 }
 0x727   : > { %s2186_s26 = smul.f32 0.0009765625, %s2393_s23  ;;  %v2191_v48 = vsub.f32 %v2157_v32, %v2190_v13  ;;  %v2192_v42 = vsub.f32 %v2158_v14, %v2190_v13  ;;  %s2628_s23 = scalar_lea.vmem %s2233_s12, 128 }
 0x728   : > { %p2629_p11 = scmp.ne.s32.totalorder %s2233_s12, %s2628_s23 }
 0x729   : > { %s2188_s11 = ssub.f32 %s2186_s26, %s2187_s25  ;;  %s2696_s25 = smov [#allocation2]  }
 0x72a   : > { %p2630_p12 = pnand %p2629_p11, %p2765_p5  ;;  %s2632_s26 = sshll.u32 %s2696_s25, 4  ;;  %s2633_s26 = int_to_ptr.vmem [resolvable:$false] %s2632_s26 }
 0x72b   : > { %s2189_s30 = smax.f32 %s2691_s16, %s2188_s11  ;;  %s2337_s16 = sshll.u32 %s2748_s22, 7 }
 0x72c   : > { %s2193_s6 = sadd.f32 1e-05, %s2189_s30  ;;  %s2230_s15 = scalar_lea.hbm %s3816_s5, %s2337_s16 }
 0x72d   : > { %p2631_p13 = pneg %p2630_p12  ;;  %s2634_s22 = scalar_lea.vmem %s2633_s26, 256 }
 0x72e   : > { %v2194_v55 = vstv %s2193_s6  ;;  %p2635_p0 = scmp.lt.s32.totalorder %s2233_s12, %s2633_s26  ;;  %p2636_p1 = scmp.lt.s32.totalorder %s2634_s22, %s2628_s23 }
 0x72f   : > { %2625 = vrsqrt.f32 %v2194_v55 }
 0x730   : > { %p2637_p2 = por %p2636_p1, %p2635_p0 }
 0x732   : > { %p2638_p3 = pnand %p2637_p2, %p2631_p13 }
 0x73c   : > { %v2626_v22 = vpop.eup %2625 }
 0x73d   : > { %2394 = vpush %v2626_v22 }
 0x76e   : > { %s2395_s9 = spop %2394 }
 0x76f   : > { %v2197_v56 = vstv %s2395_s9 }
 0x770   : > { %v2198_v6 = vmul.f32 %v2197_v56, %v2191_v48  ;;  %v2199_v57 = vmul.f32 %v2197_v56, %v2192_v42 }
 0x772   : > { %v2204_v27 = vmul.f32 %v2202_v2, %v2198_v6  ;;  %v2205_v45 = vmul.f32 %v2202_v2, %v2199_v57 }
 0x774   : > { %v2210_v58 = vadd.f32 %v2208_v31, %v2204_v27  ;;  %v2211_v62 = vadd.f32 %v2208_v31, %v2205_v45 }
 0x776   : > { %v2214_v17 = vcombine.low %v2210_v58, %v2211_v62 }
 0x778   : > { %2216 = vst [vmem:[%s217_s10] sm:$0xff] %v2214_v17 }
 0x779   : > { %2641 = shalt.err (!%p2638_p3)
}
 0x77a   : > { %s2642_s11 = scalar_lea.hbm %s2230_s15, 128  ;;  %s2646_s7 = scalar_lea.hbm %s3816_s5, 256 }
 0x77b   : > { %p2643_p4 = scmp.ne.s32.totalorder %s2230_s15, %s2642_s11  ;;  %p2647_p9 = scmp.lt.s32.totalorder %s2230_s15, %s3816_s5 }
 0x77c   : > { %p2648_p10 = scmp.lt.s32.totalorder %s2646_s7, %s2642_s11 }
 0x77d   : > { %p2644_p7 = pnand %p2643_p4, %p2765_p5 }
 0x77e   : > { %p2649_p11 = por %p2648_p10, %p2647_p9 }
 0x77f   : > { %p2645_p8 = pneg %p2644_p7 }
 0x781   : > { %p2650_p12 = pnand %p2649_p11, %p2645_p8 }
 0x783   : > { %2653 = shalt.err (!%p2650_p12)
}
 0x784   : > { %2396 = dma.vmem_to_hbm [thread:$0]  (%p2765_p5), %s2233_s12, 128, %s2230_s15, %s2218_s17  }
 0x785 PF: > { %p2402_p13 = scmp.ge.s32.totalorder %s2688_s21, 2  ;;  %s2244_s16 = sand.u32 1, %s2676_s18  }
 0x786   : > { %s2245_s10 = scalar_lea.sflag [#allocation3], %s2244_s16 }
 0x787   : > { %p2399_p0 = pnand %p2402_p13, %p2769_p6 }
 0x789   : > { %p2400_p1 = pneg %p2399_p0 }
 0x78b   : > { %2671 = dma.done.wait (%p2400_p1), %s2245_s10, 128  }
 0x78c   : > { %2673 = vsyncadd (%p2400_p1), %s2245_s10, 4294967168  ;;  %p15_p2 = scmp.ge.s32.totalorder %s2752_s24, 4   ;;  %s3877_s18 = smov %s2680_s19 }
 0x78d   : > { %s3878_s19 = smov %s2684_s20  ;;  %s3879_s20 = smov %s2763_s27 }
 0x78e   : > { %s3880_s21 = smov %s2752_s24  ;;  %17 = sbr.rel (!%p15_p2) target bundleno = 3 (0x3), region = 75 }
 0x793   :  { %2250 = vsyncpa [#allocation3], 1 }
 0x794   :  { %2252 = vsyncpa [#allocation3 + $0x1], 1 }

</bundles_post_ra>
